<compile_context>
chip_gen: v7x
topology: tpu7x:2x2x1
jax: 0.10.0
libtpu: 0.0.40
codegen_flags: <defaults>
</compile_context>

<pallas_src>
import jax
import jax.numpy as jnp
from jax import lax
from jax.experimental import pallas as pl
from jax.experimental.pallas import tpu as pltpu


def _elu(x):
    # ELU(alpha=1): x>0 -> x, else exp(x)-1  (min() keeps the dead branch finite)
    return jnp.where(x > 0, x, jnp.exp(jnp.minimum(x, 0.0)) - 1.0)


def _round_up(x, m):
    return (x + m - 1) // m * m


def _pick_time_chunk(L, target=64):
    if L <= target:
        return L
    for c in range(target, 0, -1):
        if L % c == 0:
            return c
    return L


# ---------------------------------------------------------------------------
# Kernel 1: CharCNN  (Conv1d k=3 p=1 -> ELU -> Conv1d k=3 p=1 -> ELU -> max_T)
# The 3 taps of each conv are fused into one bf16 matmul; per-tap results are
# summed via shifted lane/sublane slices.
# ---------------------------------------------------------------------------
def _make_charcnn_kernel(Nb, Tc, Tp, Cin, Ch, Co):
    def kernel(xp_ref, w1_ref, b1_ref, w2_ref, b2_ref, o_ref, hpad_ref):
        xflat = xp_ref[...].reshape(Nb * Tp, Cin)                     # bf16
        # conv1: fused taps -> [Nb, Tp, 3*Ch]; h[t] = sum_k z[t+k, tap k]
        z = jnp.dot(xflat, w1_ref[...],
                    preferred_element_type=jnp.float32).reshape(Nb, Tp, 3 * Ch)
        h = (z[:, 0:Tc, 0:Ch] + z[:, 1:Tc + 1, Ch:2 * Ch]
             + z[:, 2:Tc + 2, 2 * Ch:3 * Ch] + b1_ref[...])
        h = _elu(h)                                                   # [Nb, Tc, Ch]

        # conv-2 padding frame: only the boundary rows need to be zero
        # (valid rows are overwritten every grid step).
        hpad_ref[:, 0:1, :] = jnp.zeros((Nb, 1, Ch), hpad_ref.dtype)
        hpad_ref[:, Tc + 1:Tp, :] = jnp.zeros((Nb, Tp - Tc - 1, Ch), hpad_ref.dtype)
        hpad_ref[:, 1:Tc + 1, :] = h.astype(hpad_ref.dtype)

        hflat = hpad_ref[...].reshape(Nb * Tp, Ch)                    # bf16
        y = jnp.dot(hflat, w2_ref[...],
                    preferred_element_type=jnp.float32).reshape(Nb, Tp, 3 * Co)
        y = (y[:, 0:Tc, 0:Co] + y[:, 1:Tc + 1, Co:2 * Co]
             + y[:, 2:Tc + 2, 2 * Co:3 * Co] + b2_ref[...])
        y = _elu(y)                                                   # [Nb, Tc, Co]
        o_ref[...] = jnp.max(y, axis=1)                               # max over chars
    return kernel


def char_cnn(char_emb, w1, b1, w2, b2):
    # char_emb: [N, Tc, Cin]  ->  [N, Co]
    N, Tc, Cin = char_emb.shape
    Ch = w1.shape[2]
    Co = w2.shape[2]
    Tp = _round_up(Tc + 2, 8)                 # conv pad=1 + sublane alignment
    Nb = min(128, _round_up(N, 8))            # samples per grid step
    Npad = _round_up(N, Nb)

    xp = jnp.zeros((Npad, Tp, Cin), jnp.bfloat16)
    xp = xp.at[:N, 1:Tc + 1, :].set(char_emb.astype(jnp.bfloat16))

    # fuse the 3 conv taps: column blocks [tap0 | tap1 | tap2]
    w1c = jnp.transpose(w1, (1, 0, 2)).reshape(Cin, 3 * Ch).astype(jnp.bfloat16)
    w2c = jnp.transpose(w2, (1, 0, 2)).reshape(Ch, 3 * Co).astype(jnp.bfloat16)

    kernel = _make_charcnn_kernel(Nb, Tc, Tp, Cin, Ch, Co)
    out = pl.pallas_call(
        kernel,
        grid=(Npad // Nb,),
        in_specs=[
            pl.BlockSpec((Nb, Tp, Cin), lambda n: (n, 0, 0)),
            pl.BlockSpec((Cin, 3 * Ch), lambda n: (0, 0)),
            pl.BlockSpec((1, Ch), lambda n: (0, 0)),
            pl.BlockSpec((Ch, 3 * Co), lambda n: (0, 0)),
            pl.BlockSpec((1, Co), lambda n: (0, 0)),
        ],
        out_specs=pl.BlockSpec((Nb, Co), lambda n: (n, 0)),
        out_shape=jax.ShapeDtypeStruct((Npad, Co), jnp.float32),
        scratch_shapes=[pltpu.VMEM((Nb, Tp, Ch), jnp.bfloat16)],
        compiler_params=pltpu.CompilerParams(dimension_semantics=("parallel",)),
    )(xp, w1c, b1, w2c, b2)
    return out[:N]


# ---------------------------------------------------------------------------
# Kernel 2: fused bidirectional VarFastLSTM layer (both directions in ONE
# recurrence step).  State: [Bp, 2H] = [fwd | bwd].  Recurrent weight is the
# block-diagonal [2H, 8H] with gate column order [i_f i_b f_f f_b o_f o_b c_f c_b].
# xp_comb[t] already holds (x@Wih+b) for fwd@t and bwd@(L-1-t).  Time is
# chunked over a grid axis marked "arbitrary"; h/c scratch carries the state.
# ---------------------------------------------------------------------------
def _make_bilstm_kernel(TCH, Bp, H):
    H2, H4, H6, H8 = 2 * H, 4 * H, 6 * H, 8 * H

    def kernel(xp_ref, w_ref, m_ref, o_ref, h_scr, c_scr):
        @pl.when(pl.program_id(0) == 0)
        def _():
            h_scr[...] = jnp.zeros_like(h_scr)
            c_scr[...] = jnp.zeros_like(c_scr)

        w = w_ref[...]                                   # [2H, 8H] bf16, hoisted

        def step(j, carry):
            h_prev = h_scr[...]
            c_prev = c_scr[...]
            g = xp_ref[j].astype(jnp.float32) + jnp.dot(
                h_prev.astype(jnp.bfloat16), w,
                preferred_element_type=jnp.float32)       # [Bp, 8H]
            sig = jax.nn.sigmoid(g[:, 0:H6])              # one contiguous i|f|o slab
            i_g = sig[:, 0:H2]
            f_g = sig[:, H2:H4]
            o_g = sig[:, H4:H6]
            c_g = jnp.tanh(g[:, H6:H8])
            c_new = f_g * c_prev + i_g * c_g
            h_new = o_g * jnp.tanh(c_new)
            mrow = m_ref[j]                               # [Bp, 2] (fwd mask, bwd mask)
            m_cat = jnp.concatenate(
                [jnp.broadcast_to(mrow[:, 0:1], (Bp, H)),
                 jnp.broadcast_to(mrow[:, 1:2], (Bp, H))], axis=1)
            h_t = h_prev + (h_new - h_prev) * m_cat       # VarFastLSTM masked step
            c_t = c_prev + (c_new - c_prev) * m_cat
            h_scr[...] = h_t
            c_scr[...] = c_t
            o_ref[j] = h_t                                # [Bp, 2H] contiguous store
            return carry

        lax.fori_loop(0, TCH, step, 0, unroll=True)

    return kernel


def bilstm_layer(xp_comb, w_comb, mask2):
    # xp_comb: [L, Bp, 8H] bf16; w_comb: [2H, 8H] bf16; mask2: [L, Bp, 2] f32
    # returns raw [L, Bp, 2H] with raw[t] = [h_fwd(t) | h_bwd(L-1-t)]
    L, Bp, G = xp_comb.shape
    H = G // 8
    TCH = _pick_time_chunk(L)
    kernel = _make_bilstm_kernel(TCH, Bp, H)

    flops = 2 * L * Bp * (2 * H) * (8 * H) + 12 * L * Bp * 2 * H
    transc = 10 * L * Bp * H
    bytes_acc = (xp_comb.size * 2 + L * Bp * 2 * H * 4
                 + mask2.size * 4 + w_comb.size * 2)
    vmem_est = (2 * (TCH * Bp * 8 * H * 2 + TCH * Bp * 2 * H * 4 + TCH * Bp * 2 * 4)
                + 2 * H * 8 * H * 2 + 2 * Bp * 2 * H * 4)
    vmem_limit = int(min(max(4 * vmem_est, 8 << 20), 48 << 20))

    return pl.pallas_call(
        kernel,
        grid=(L // TCH,),
        in_specs=[
            pl.BlockSpec((TCH, Bp, 8 * H), lambda c: (c, 0, 0)),
            pl.BlockSpec((2 * H, 8 * H), lambda c: (0, 0)),
            pl.BlockSpec((TCH, Bp, 2), lambda c: (c, 0, 0)),
        ],
        out_specs=pl.BlockSpec((TCH, Bp, 2 * H), lambda c: (c, 0, 0)),
        out_shape=jax.ShapeDtypeStruct((L, Bp, 2 * H), jnp.float32),
        scratch_shapes=[pltpu.VMEM((Bp, 2 * H), jnp.float32),
                        pltpu.VMEM((Bp, 2 * H), jnp.float32)],
        compiler_params=pltpu.CompilerParams(
            dimension_semantics=("arbitrary",),
            vmem_limit_bytes=vmem_limit),
        cost_estimate=pl.CostEstimate(flops=int(flops),
                                      transcendentals=int(transc),
                                      bytes_accessed=int(bytes_acc)),
    )(xp_comb, w_comb, mask2)


# ---- offline gate re-packing helpers (PyTorch order i,f,c,o -> i,f,o,c) -----
_GATE_PERM = (0, 1, 3, 2)


def _reorder_gates_ih(w_ih):
    # [4H, Din] -> [Din, 4, H], gate order (i, f, o, c)
    G4, Din = w_ih.shape
    H = G4 // 4
    wt = jnp.transpose(w_ih).reshape(Din, 4, H)
    return wt[:, jnp.array(_GATE_PERM), :]


def _reorder_gates_bias(b):
    H = b.shape[0] // 4
    return b.reshape(4, H)[jnp.array(_GATE_PERM)]       # [4, H]


def _combine_hh(whh_f, whh_b):
    # [4H, H] per direction -> block-diagonal [2H, 8H], gate-major columns
    # [i_f i_b f_f f_b o_f o_b c_f c_b]
    H = whh_f.shape[1]

    def reord(w):
        wt = jnp.transpose(w).reshape(H, 4, H)
        return wt[:, jnp.array(_GATE_PERM), :]           # [H, 4, H]

    wc = jnp.zeros((2, H, 4, 2, H), jnp.float32)
    wc = wc.at[0, :, :, 0, :].set(reord(whh_f))
    wc = wc.at[1, :, :, 1, :].set(reord(whh_b))
    return wc.reshape(2 * H, 8 * H).astype(jnp.bfloat16)


def _build_xproj(x_lbd, lp, H):
    # Hoisted input projection for both directions; bwd flipped in time so the
    # kernel consumes fwd@t and bwd@(L-1-t) at the same loop index.
    L, Bp, _ = x_lbd.shape
    xb = x_lbd.astype(jnp.bfloat16)
    xps = []
    for d in range(2):
        wih = _reorder_gates_ih(lp[d]['w_ih']).astype(jnp.bfloat16)   # [D, 4, H]
        bias = _reorder_gates_bias(lp[d]['b_ih'] + lp[d]['b_hh'])     # [4, H]
        xp = jnp.einsum('lbd,dgh->lbgh', xb, wih,
                        preferred_element_type=jnp.float32) + bias
        xps.append(xp)
    xp_f = xps[0]
    xp_b = jnp.flip(xps[1], axis=0)
    xp_comb = jnp.stack([xp_f, xp_b], axis=3)             # [L, Bp, 4, 2, H]
    return xp_comb.reshape(L, Bp, 8 * H).astype(jnp.bfloat16)


# ---------------------------------------------------------------------------
# Kernel 3a: hoisted head projection  y = ELU([B*L, OD] @ [OD, Fpad] + b)
# (arc_h | arc_c | type_h | type_c fused, Fpad is a multiple of 128)
# ---------------------------------------------------------------------------
def _proj_kernel(x_ref, w_ref, b_ref, y_ref):
    y = jnp.dot(x_ref[...], w_ref[...],
                preferred_element_type=jnp.float32) + b_ref[...]
    y_ref[...] = _elu(y)


# ---------------------------------------------------------------------------
# Kernel 3b: per-sentence BiAffine arc scorer
# out_arc[i,j] = arc_h[i] U arc_c[j]^T + arc_h[i].q + k.arc_c[j] + b, masked.
# ---------------------------------------------------------------------------
def _biaffine_kernel(ah_ref, ac_ref, mq_ref, mk_ref,
                     u_ref, q_ref, k_ref, bb_ref, arc_ref):
    ah = ah_ref[0].astype(jnp.bfloat16)                   # [L, A]
    ac = ac_ref[0].astype(jnp.bfloat16)                   # [L, A]
    hU = jnp.dot(ah, u_ref[...], preferred_element_type=jnp.float32)      # [L, A]
    s = lax.dot_general(hU.astype(jnp.bfloat16), ac, (((1,), (1,)), ((), ())),
                        preferred_element_type=jnp.float32)               # [L, L]
    qpart = jnp.dot(ah, q_ref[...], preferred_element_type=jnp.float32)   # [L, 1]
    kpart = lax.dot_general(k_ref[...], ac, (((0,), (1,)), ((), ())),
                            preferred_element_type=jnp.float32)           # [1, L]
    s = s + qpart + kpart + bb_ref[...]
    arc_ref[0] = s * mq_ref[0] * mk_ref[0]


def heads_and_biaffine(out_rnn, mask, p):
    B, L, OD = out_rnn.shape
    A = p['arc_h_w'].shape[1]
    T = p['type_h_w'].shape[1]
    F = 2 * A + 2 * T
    Fp = _round_up(F, 128)                                # lane-dense output

    w_head = jnp.concatenate([p['arc_h_w'], p['arc_c_w'],
                              p['type_h_w'], p['type_c_w']], axis=1)
    b_head = jnp.concatenate([p['arc_h_b'], p['arc_c_b'],
                              p['type_h_b'], p['type_c_b']], axis=1)
    w_head = jnp.zeros((OD, Fp), jnp.float32).at[:, :F].set(w_head).astype(jnp.bfloat16)
    b_head = jnp.zeros((1, Fp), jnp.float32).at[:, :F].set(b_head)

    M = B * L
    Mb = min(256, _round_up(M, 8))
    Mpad = _round_up(M, Mb)
    x = jnp.zeros((Mpad, OD), jnp.bfloat16)
    x = x.at[:M].set(out_rnn.reshape(M, OD).astype(jnp.bfloat16))

    y = pl.pallas_call(
        _proj_kernel,
        grid=(Mpad // Mb,),
        in_specs=[pl.BlockSpec((Mb, OD), lambda i: (i, 0)),
                  pl.BlockSpec((OD, Fp), lambda i: (0, 0)),
                  pl.BlockSpec((1, Fp), lambda i: (0, 0))],
        out_specs=pl.BlockSpec((Mb, Fp), lambda i: (i, 0)),
        out_shape=jax.ShapeDtypeStruct((Mpad, Fp), jnp.float32),
        compiler_params=pltpu.CompilerParams(dimension_semantics=("parallel",)),
    )(x, w_head, b_head)

    y = y[:M]
    arc_h = y[:, 0:A].reshape(B, L, A)
    arc_c = y[:, A:2 * A].reshape(B, L, A)
    type_h = y[:, 2 * A:2 * A + T].reshape(B, L, T)
    type_c = y[:, 2 * A + T:2 * A + 2 * T].reshape(B, L, T)

    mask_q = mask[:, :, None]                             # [B, L, 1]
    mask_k = mask[:, None, :]                             # [B, 1, L]

    out_arc = pl.pallas_call(
        _biaffine_kernel,
        grid=(B,),
        in_specs=[
            pl.BlockSpec((1, L, A), lambda b: (b, 0, 0)),
            pl.BlockSpec((1, L, A), lambda b: (b, 0, 0)),
            pl.BlockSpec((1, L, 1), lambda b: (b, 0, 0)),
            pl.BlockSpec((1, 1, L), lambda b: (b, 0, 0)),
            pl.BlockSpec((A, A), lambda b: (0, 0)),
            pl.BlockSpec((A, 1), lambda b: (0, 0)),
            pl.BlockSpec((A, 1), lambda b: (0, 0)),
            pl.BlockSpec((1, 1), lambda b: (0, 0)),
        ],
        out_specs=pl.BlockSpec((1, L, L), lambda b: (b, 0, 0)),
        out_shape=jax.ShapeDtypeStruct((B, L, L), jnp.float32),
        compiler_params=pltpu.CompilerParams(dimension_semantics=("parallel",)),
    )(arc_h, arc_c, mask_q, mask_k,
      p['biaffine_U'].astype(jnp.bfloat16),
      p['biaffine_q'].astype(jnp.bfloat16),
      p['biaffine_k'].astype(jnp.bfloat16),
      p['biaffine_b'])
    return out_arc, type_h, type_c


# ---------------------------------------------------------------------------
# Parameter init (deterministic, synthetic) + forward glue
# ---------------------------------------------------------------------------
def init_params(key, cfg):
    ks = iter(jax.random.split(key, 64))

    def u(shape, scale=0.1):
        return jax.random.uniform(next(ks), shape, jnp.float32, -scale, scale)

    p = {}
    p['word_embed'] = u((cfg['num_words'], cfg['word_dim'])).at[1].set(0.0)  # padding_idx=1
    p['char_embed'] = u((cfg['num_chars'], cfg['char_dim'])).at[1].set(0.0)
    p['pos_embed'] = u((cfg['num_pos'], cfg['pos_dim'])).at[1].set(0.0)

    Dc = cfg['char_dim']
    Ch = 4 * Dc
    p['cnn_w1'] = u((3, Dc, Ch), 0.3)
    p['cnn_b1'] = u((1, Ch), 0.1)
    p['cnn_w2'] = u((3, Ch, Dc), 0.3)
    p['cnn_b2'] = u((1, Dc), 0.1)

    H = cfg['hidden_size']
    dim_enc = cfg['word_dim'] + cfg['char_dim'] + cfg['pos_dim']
    lstm = []
    d_in = dim_enc
    for _layer in range(cfg['num_layers']):
        dirs = []
        for _d in range(2):
            dirs.append(dict(w_ih=u((4 * H, d_in), 0.2),
                             w_hh=u((4 * H, H), 0.2),
                             b_ih=u((4 * H,), 0.1),
                             b_hh=u((4 * H,), 0.1)))
        lstm.append(dirs)
        d_in = 2 * H
    p['lstm'] = lstm

    OD = 2 * H
    A, T = cfg['arc_space'], cfg['type_space']
    p['arc_h_w'] = u((OD, A), 0.2); p['arc_h_b'] = jnp.zeros((1, A), jnp.float32)
    p['arc_c_w'] = u((OD, A), 0.2); p['arc_c_b'] = jnp.zeros((1, A), jnp.float32)
    p['type_h_w'] = u((OD, T), 0.2); p['type_h_b'] = jnp.zeros((1, T), jnp.float32)
    p['type_c_w'] = u((OD, T), 0.2); p['type_c_b'] = jnp.zeros((1, T), jnp.float32)
    p['biaffine_U'] = u((A, A), 0.2)
    p['biaffine_q'] = u((A, 1), 0.2)
    p['biaffine_k'] = u((A, 1), 0.2)
    p['biaffine_b'] = jnp.zeros((1, 1), jnp.float32)
    return p


def stackptr_encoder_forward(params, input_word, input_char, input_pos, mask):
    B, L = input_word.shape
    Tc = input_char.shape[2]
    H = params['lstm'][0][0]['w_hh'].shape[1]

    word = params['word_embed'][input_word]                # [B, L, Dw]
    pos = params['pos_embed'][input_pos]                   # [B, L, Dp]
    chv = params['char_embed'][input_char]                 # [B, L, Tc, Dc]
    Dc = chv.shape[-1]
    char_feat = char_cnn(chv.reshape(B * L, Tc, Dc),
                         params['cnn_w1'], params['cnn_b1'],
                         params['cnn_w2'], params['cnn_b2']).reshape(B, L, Dc)

    # dropout_in: identity (eval mode)
    enc = jnp.concatenate([word, char_feat, pos], axis=2)  # [B, L, dim_enc]

    # time-major, batch padded to a full sublane (padded rows have mask 0)
    Bp = _round_up(B, 8)
    x = jnp.zeros((L, Bp, enc.shape[-1]), jnp.float32)
    x = x.at[:, :B, :].set(jnp.transpose(enc, (1, 0, 2)))
    mask_lb = jnp.zeros((L, Bp), jnp.float32).at[:, :B].set(jnp.transpose(mask))
    mask2 = jnp.stack([mask_lb, jnp.flip(mask_lb, axis=0)], axis=-1)   # [L, Bp, 2]

    out = x
    for lp in params['lstm']:
        xp_comb = _build_xproj(out, lp, H)                 # [L, Bp, 8H] bf16
        w_comb = _combine_hh(lp[0]['w_hh'], lp[1]['w_hh']) # [2H, 8H] bf16
        raw = bilstm_layer(xp_comb, w_comb, mask2)         # [L, Bp, 2H]
        # raw[t] = [h_fwd(t) | h_bwd(L-1-t)] -> standard time orientation
        out = jnp.concatenate([raw[:, :, :H],
                               jnp.flip(raw[:, :, H:], axis=0)], axis=-1)

    out_rnn = jnp.transpose(out[:, :B, :], (1, 0, 2))      # [B, L, 2H]

    # dropout_out: identity (eval mode)
    out_arc, type_h, type_c = heads_and_biaffine(out_rnn, mask, params)
    return out_arc, (type_h, type_c)


if __name__ == "__main__":
    cfg = dict(word_dim=16, num_words=50, char_dim=8, num_chars=30,
               pos_dim=8, num_pos=12, hidden_size=32, num_layers=2,
               num_labels=12, arc_space=32, type_space=24)
    key = jax.random.PRNGKey(0)
    pkey, k1, k2, k3 = jax.random.split(key, 4)
    params = init_params(pkey, cfg)

    B, L, Tc = 2, 8, 8
    input_word = jax.random.randint(k1, (B, L), 0, cfg['num_words'], jnp.int32)
    input_char = jax.random.randint(k2, (B, L, Tc), 0, cfg['num_chars'], jnp.int32)
    input_pos = jax.random.randint(k3, (B, L), 0, cfg['num_pos'], jnp.int32)
    mask = jnp.ones((B, L), jnp.float32).at[1, 6:].set(0.0)   # ragged second sentence

    out_arc, (type_h, type_c) = stackptr_encoder_forward(
        params, input_word, input_char, input_pos, mask)
    jax.block_until_ready((out_arc, type_h, type_c))

    assert out_arc.shape == (B, L, L)
    assert type_h.shape == (B, L, cfg['type_space'])
    assert type_c.shape == (B, L, cfg['type_space'])
    print("KERNEL_OK")
</pallas_src>

<mosaic_0001>
module attributes {stable_mosaic.version = 11 : i64} {
  func.func @kernel(%arg0: i32, %arg1: memref<16x16x8xbf16, #tpu.memory_space<vmem>>, %arg2: memref<8x96xbf16, #tpu.memory_space<vmem>>, %arg3: memref<1x32xf32, #tpu.memory_space<vmem>>, %arg4: memref<32x24xbf16, #tpu.memory_space<vmem>>, %arg5: memref<1x8xf32, #tpu.memory_space<vmem>>, %arg6: memref<16x8xf32, #tpu.memory_space<vmem>>, %arg7: memref<16x16x32xbf16, #tpu.memory_space<vmem>>) attributes {dimension_semantics = [#tpu.dimension_semantics<parallel>], iteration_bounds = array<i64: 1>, scalar_prefetch = 0 : i64, scratch_operands = 1 : i64, tpu.core_type = #tpu.core_type<tc>, window_params = [{transform_indices = @transform_0, window_bounds = array<i64: 16, 16, 8>}, {pipeline_mode = #tpu.pipeline_mode<synchronous>, transform_indices = @transform_1, window_bounds = array<i64: 8, 96>}, {pipeline_mode = #tpu.pipeline_mode<synchronous>, transform_indices = @transform_2, window_bounds = array<i64: 1, 32>}, {pipeline_mode = #tpu.pipeline_mode<synchronous>, transform_indices = @transform_3, window_bounds = array<i64: 32, 24>}, {pipeline_mode = #tpu.pipeline_mode<synchronous>, transform_indices = @transform_4, window_bounds = array<i64: 1, 8>}, {transform_indices = @transform_5, window_bounds = array<i64: 16, 8>}]} {
    %c0 = arith.constant 0 : index
    %c0_0 = arith.constant 0 : index
    %c0_1 = arith.constant 0 : index
    %0 = vector.load %arg1[%c0, %c0_0, %c0_1] : memref<16x16x8xbf16, #tpu.memory_space<vmem>>, vector<16x16x8xbf16>
    %1 = vector.shape_cast %0 : vector<16x16x8xbf16> to vector<256x8xbf16>
    %c0_2 = arith.constant 0 : index
    %c0_3 = arith.constant 0 : index
    %2 = vector.load %arg2[%c0_2, %c0_3] : memref<8x96xbf16, #tpu.memory_space<vmem>>, vector<8x96xbf16>
    %cst = arith.constant dense<0.000000e+00> : vector<256x96xf32>
    %3 = tpu.matmul %1, %2, %cst {dimension_numbers = #tpu.dot_dimension_numbers<[1], [0], [0], [1], [0, 0, 1, 1], [], []>} : vector<256x8xbf16>, vector<8x96xbf16>, vector<256x96xf32> -> vector<256x96xf32>
    %4 = vector.shape_cast %3 : vector<256x96xf32> to vector<16x16x96xf32>
    %5 = vector.extract_strided_slice %4 {offsets = [0, 0, 0], sizes = [16, 8, 32], strides = [1, 1, 1]} : vector<16x16x96xf32> to vector<16x8x32xf32>
    %6 = vector.extract_strided_slice %4 {offsets = [0, 1, 32], sizes = [16, 8, 32], strides = [1, 1, 1]} : vector<16x16x96xf32> to vector<16x8x32xf32>
    %7 = arith.addf %5, %6 : vector<16x8x32xf32>
    %8 = vector.extract_strided_slice %4 {offsets = [0, 2, 64], sizes = [16, 8, 32], strides = [1, 1, 1]} : vector<16x16x96xf32> to vector<16x8x32xf32>
    %9 = arith.addf %7, %8 : vector<16x8x32xf32>
    %c0_4 = arith.constant 0 : index
    %c0_5 = arith.constant 0 : index
    %10 = vector.load %arg3[%c0_4, %c0_5] : memref<1x32xf32, #tpu.memory_space<vmem>>, vector<1x32xf32>
    %11 = vector.shape_cast %10 : vector<1x32xf32> to vector<1x1x32xf32>
    %12 = vector.broadcast %11 : vector<1x1x32xf32> to vector<16x8x32xf32>
    %13 = arith.addf %9, %12 : vector<16x8x32xf32>
    %cst_6 = arith.constant 0.000000e+00 : f32
    %14 = vector.broadcast %cst_6 : f32 to vector<16x8x32xf32>
    %15 = arith.cmpf ogt, %13, %14 : vector<16x8x32xf32>
    %cst_7 = arith.constant 0.000000e+00 : f32
    %16 = vector.broadcast %cst_7 : f32 to vector<16x8x32xf32>
    %17 = arith.minimumf %13, %16 : vector<16x8x32xf32>
    %18 = math.exp %17 : vector<16x8x32xf32>
    %cst_8 = arith.constant 1.000000e+00 : f32
    %19 = vector.broadcast %cst_8 : f32 to vector<16x8x32xf32>
    %20 = arith.subf %18, %19 : vector<16x8x32xf32>
    %21 = arith.select %15, %13, %20 : vector<16x8x32xi1>, vector<16x8x32xf32>
    %cst_9 = arith.constant 0.000000e+00 : bf16
    %22 = vector.broadcast %cst_9 : bf16 to vector<16x1x32xbf16>
    %c0_10 = arith.constant 0 : index
    %c0_11 = arith.constant 0 : index
    %c0_12 = arith.constant 0 : index
    %23 = vector.load %arg7[%c0_10, %c0_11, %c0_12] : memref<16x16x32xbf16, #tpu.memory_space<vmem>>, vector<16x1x32xbf16>
    tpu.vector_store %arg7[%c0_10, %c0_11, %c0_12], %22 {strides = array<i32>} : memref<16x16x32xbf16, #tpu.memory_space<vmem>>, vector<16x1x32xbf16>,
    %cst_13 = arith.constant 0.000000e+00 : bf16
    %24 = vector.broadcast %cst_13 : bf16 to vector<16x7x32xbf16>
    %c0_14 = arith.constant 0 : index
    %c9 = arith.constant 9 : index
    %c0_15 = arith.constant 0 : index
    %25 = vector.load %arg7[%c0_14, %c9, %c0_15] : memref<16x16x32xbf16, #tpu.memory_space<vmem>>, vector<16x7x32xbf16>
    tpu.vector_store %arg7[%c0_14, %c9, %c0_15], %24 {strides = array<i32>} : memref<16x16x32xbf16, #tpu.memory_space<vmem>>, vector<16x7x32xbf16>,
    %26 = arith.truncf %21 : vector<16x8x32xf32> to vector<16x8x32xbf16>
    %c0_16 = arith.constant 0 : index
    %c1 = arith.constant 1 : index
    %c0_17 = arith.constant 0 : index
    %27 = vector.load %arg7[%c0_16, %c1, %c0_17] : memref<16x16x32xbf16, #tpu.memory_space<vmem>>, vector<16x8x32xbf16>
    tpu.vector_store %arg7[%c0_16, %c1, %c0_17], %26 {strides = array<i32>} : memref<16x16x32xbf16, #tpu.memory_space<vmem>>, vector<16x8x32xbf16>,
    %c0_18 = arith.constant 0 : index
    %c0_19 = arith.constant 0 : index
    %c0_20 = arith.constant 0 : index
    %28 = vector.load %arg7[%c0_18, %c0_19, %c0_20] : memref<16x16x32xbf16, #tpu.memory_space<vmem>>, vector<16x16x32xbf16>
    %29 = vector.shape_cast %28 : vector<16x16x32xbf16> to vector<256x32xbf16>
    %c0_21 = arith.constant 0 : index
    %c0_22 = arith.constant 0 : index
    %30 = vector.load %arg4[%c0_21, %c0_22] : memref<32x24xbf16, #tpu.memory_space<vmem>>, vector<32x24xbf16>
    %cst_23 = arith.constant dense<0.000000e+00> : vector<256x24xf32>
    %31 = tpu.matmul %29, %30, %cst_23 {dimension_numbers = #tpu.dot_dimension_numbers<[1], [0], [0], [1], [0, 0, 1, 1], [], []>} : vector<256x32xbf16>, vector<32x24xbf16>, vector<256x24xf32> -> vector<256x24xf32>
    %32 = vector.shape_cast %31 : vector<256x24xf32> to vector<16x16x24xf32>
    %33 = vector.extract_strided_slice %32 {offsets = [0, 0, 0], sizes = [16, 8, 8], strides = [1, 1, 1]} : vector<16x16x24xf32> to vector<16x8x8xf32>
    %34 = vector.extract_strided_slice %32 {offsets = [0, 1, 8], sizes = [16, 8, 8], strides = [1, 1, 1]} : vector<16x16x24xf32> to vector<16x8x8xf32>
    %35 = arith.addf %33, %34 : vector<16x8x8xf32>
    %36 = vector.extract_strided_slice %32 {offsets = [0, 2, 16], sizes = [16, 8, 8], strides = [1, 1, 1]} : vector<16x16x24xf32> to vector<16x8x8xf32>
    %37 = arith.addf %35, %36 : vector<16x8x8xf32>
    %c0_24 = arith.constant 0 : index
    %c0_25 = arith.constant 0 : index
    %38 = vector.load %arg5[%c0_24, %c0_25] : memref<1x8xf32, #tpu.memory_space<vmem>>, vector<1x8xf32>
    %39 = vector.shape_cast %38 : vector<1x8xf32> to vector<1x1x8xf32>
    %40 = vector.broadcast %39 : vector<1x1x8xf32> to vector<16x8x8xf32>
    %41 = arith.addf %37, %40 : vector<16x8x8xf32>
    %cst_26 = arith.constant 0.000000e+00 : f32
    %42 = vector.broadcast %cst_26 : f32 to vector<16x8x8xf32>
    %43 = arith.cmpf ogt, %41, %42 : vector<16x8x8xf32>
    %cst_27 = arith.constant 0.000000e+00 : f32
    %44 = vector.broadcast %cst_27 : f32 to vector<16x8x8xf32>
    %45 = arith.minimumf %41, %44 : vector<16x8x8xf32>
    %46 = math.exp %45 : vector<16x8x8xf32>
    %cst_28 = arith.constant 1.000000e+00 : f32
    %47 = vector.broadcast %cst_28 : f32 to vector<16x8x8xf32>
    %48 = arith.subf %46, %47 : vector<16x8x8xf32>
    %49 = arith.select %43, %41, %48 : vector<16x8x8xi1>, vector<16x8x8xf32>
    %cst_29 = arith.constant dense<0xFF800000> : vector<16x8xf32>
    %50 = vector.multi_reduction <maximumf>, %49, %cst_29 [1] : vector<16x8x8xf32> to vector<16x8xf32>
    %c0_30 = arith.constant 0 : index
    %c0_31 = arith.constant 0 : index
    %51 = vector.load %arg6[%c0_30, %c0_31] : memref<16x8xf32, #tpu.memory_space<vmem>>, vector<16x8xf32>
    tpu.vector_store %arg6[%c0_30, %c0_31], %50 {strides = array<i32>} : memref<16x8xf32, #tpu.memory_space<vmem>>, vector<16x8xf32>,
    return
  }
  func.func @transform_0(%arg0: i32) -> (i32, i32, i32) {
    %c0_i32 = arith.constant 0 : i32
    %c0_i32_0 = arith.constant 0 : i32
    %c0_i32_1 = arith.constant 0 : i32
    return %arg0, %c0_i32, %c0_i32_0 : i32, i32, i32
  }
  func.func @transform_1(%arg0: i32) -> (i32, i32) {
    %c0_i32 = arith.constant 0 : i32
    %c0_i32_0 = arith.constant 0 : i32
    %c0_i32_1 = arith.constant 0 : i32
    return %c0_i32, %c0_i32_0 : i32, i32
  }
  func.func @transform_2(%arg0: i32) -> (i32, i32) {
    %c0_i32 = arith.constant 0 : i32
    %c0_i32_0 = arith.constant 0 : i32
    %c0_i32_1 = arith.constant 0 : i32
    return %c0_i32, %c0_i32_0 : i32, i32
  }
  func.func @transform_3(%arg0: i32) -> (i32, i32) {
    %c0_i32 = arith.constant 0 : i32
    %c0_i32_0 = arith.constant 0 : i32
    %c0_i32_1 = arith.constant 0 : i32
    return %c0_i32, %c0_i32_0 : i32, i32
  }
  func.func @transform_4(%arg0: i32) -> (i32, i32) {
    %c0_i32 = arith.constant 0 : i32
    %c0_i32_0 = arith.constant 0 : i32
    %c0_i32_1 = arith.constant 0 : i32
    return %c0_i32, %c0_i32_0 : i32, i32
  }
  func.func @transform_5(%arg0: i32) -> (i32, i32) {
    %c0_i32 = arith.constant 0 : i32
    %c0_i32_0 = arith.constant 0 : i32
    return %arg0, %c0_i32 : i32, i32
  }
}

</mosaic_0001>

<bundles_post_ra>
// kernel: tpu_custom_call.1
= control target key start
LH: loop header
LB: loop body
LE: loop exit
PB: predicated region body
PF: predicated region fallthrough
CT: control target
= control target key end

     0   :  { %vm183_vm0 = vcmask 1043456   ;;  %vm134_vm1 = vcmask 64512   ;;  %vm725_vm2 = vcmask 253952   ;;  %vm726_vm3 = vsmask.f32 256  ;;  %s2075_s6 = smov 112   ;;  %s2808_s1 = inlined_call_operand.vmem [shape: bf16[8,96], index: 1, kind: input, shape index: {}]   ;;  %s2809_s0 = inlined_call_operand.vmem [shape: bf16[16,16,8], index: 0, kind: input, shape index: {}]   ;;  %s2810_s3 = inlined_call_operand.vmem [shape: bf16[32,24], index: 3, kind: input, shape index: {}]   ;;  %s2811_s2 = inlined_call_operand.vmem [shape: f32[1,32], index: 2, kind: input, shape index: {}]   ;;  %s2812_s4 = inlined_call_operand.vmem [shape: f32[1,8], index: 4, kind: input, shape index: {}]   ;;  %s2813_s5 = inlined_call_operand.vmem [shape: f32[16,8], index: 5, kind: output, shape index: {}]  }
   0x1   :  { %v53_v0 = vld [vmem:[%s2808_s1] sm:$0xf]  ;;  %v1991_v3 = vld [vmem:[%s2809_s0 + $0x8] sm:$0xff]   ;;  %v1992_v4 = vld [vmem:[%s2809_s0 + $0x10] sm:$0xff]   ;;  %vm776_vm4 = vcmask 261124   ;;  %vm493_vm8 = vcmask 1045504  }
   0x2   :  { %1985 = vmatprep.subr.msk.bf16.mxu0 %vm183_vm0, %v53_v0  ;;  %v185_v1 = vsel %vm183_vm0, %v53_v0, 0  ;;  %v1990_v2 = vld [vmem:[%s2809_s0] sm:$0xff]   ;;  %v1993_v5 = vld [vmem:[%s2809_s0 + $0x18] sm:$0xff]   ;;  %v1995_v7 = vld [vmem:[%s2809_s0 + $0x28] sm:$0xff]   ;;  %vm777_vm6 = vsmask.f32 7954 }
   0x3   :  { %1916 = vmatpush3.bf16.msra.mxu0 %v185_v1  ;;  %1917 = vmatprep.mubr.msk.bf16.mxu0 %vm134_vm1, %v1990_v2  ;;  %v1994_v6 = vld [vmem:[%s2809_s0 + $0x20] sm:$0xff]   ;;  %v1996_v8 = vld [vmem:[%s2809_s0 + $0x30] sm:$0xff]   ;;  %v1997_v9 = vld [vmem:[%s2809_s0 + $0x38] sm:$0xff]   ;;  %vm380_vm9 = vcmask 1046528   ;;  %s2073_s1 = smov 96   ;;  %vm971_vm11 = vcmask 258048  }
   0x4   :  { %v1998_v10 = vld [vmem:[%s2809_s0 + $0x40] sm:$0xff]   ;;  %v1999_v11 = vld [vmem:[%s2809_s0 + $0x48] sm:$0xff]   ;;  %v2000_v12 = vld [vmem:[%s2809_s0 + $0x50] sm:$0xff]   ;;  %vm972_vm12 = vsmask.f32 4354 }
   0x5   :  { %v2001_v13 = vld [vmem:[%s2809_s0 + $0x58] sm:$0xff]   ;;  %v2002_v14 = vld [vmem:[%s2809_s0 + $0x60] sm:$0xff]   ;;  %v2003_v15 = vld [vmem:[%s2809_s0 + $0x68] sm:$0xff]  }
   0x6   :  { %1918 = vmatmul.mubr.msk.bf16.vlgmr.msra.gmra.mrb[0].mxu0 %vm134_vm1, %v1991_v3  ;;  %v2004_v16 = vld [vmem:[%s2809_s0 + $0x70] sm:$0xff]   ;;  %v2005_v17 = vld [vmem:[%s2809_s0 + $0x78] sm:$0xff]   ;;  %v728_v18 = vld [vmem:[#allocation2] sm:$0x1]  ;;  %s2072_s0 = smov 64  }
   0x7   :  { %1921 = vmatprep.mubr.msk.bf16.mxu0 %vm134_vm1, %v1992_v4  ;;  %vm2173_vm5 = vmand %vm725_vm2, %vm726_vm3  ;;  %v779_v20 = vld [vmem:[#allocation2] sm:$0xf0]  ;;  %v731_v4 = vld [vmem:[#allocation2 + $0x8] sm:$0x1]  ;;  %vm1054_vm2 = vcmask 261120  }
   0x8   :  { %v729_v21 = vsel %vm2173_vm5, 0, %v728_v18  ;;  %vm2179_vm7 = vmand %vm776_vm4, %vm777_vm6  ;;  %v737_v18 = vld [vmem:[#allocation2 + $0x18] sm:$0x1] }
   0x9   :  { %730 = vst [vmem:[#allocation2] sm:$0x1] %v729_v21  ;;  %v780_v23 = vsel %vm2179_vm7, 0, %v779_v20  ;;  %vm2412_vm14 = vmand %vm971_vm11, %vm972_vm12 }
   0xa   :  { %781 = vst [vmem:[#allocation2] sm:$0xf0] %v780_v23 }
   0xe   :  { %1922 = vmatmul.mubr.msk.bf16.gmra.mrb[4].mxu0 %vm134_vm1, %v1993_v5  ;;  %v782_v5 = vld [vmem:[#allocation2 + $0x8] sm:$0xf0] }
   0xf   :  { %1925 = vmatprep.mubr.msk.bf16.mxu0 %vm134_vm1, %v1994_v6 }
  0x16   :  { %1926 = vmatmul.mubr.msk.bf16.gmra.mrb[8].mxu0 %vm134_vm1, %v1995_v7 }
  0x17   :  { %1929 = vmatprep.mubr.msk.bf16.mxu0 %vm134_vm1, %v1996_v8  ;;  %v732_v8 = vsel %vm2173_vm5, 0, %v731_v4  ;;  %v2007_v4 = vld [vmem:[%s2810_s3 + $0x8] sm:$0xff]  }
  0x18   :  { %733 = vst [vmem:[#allocation2 + $0x8] sm:$0x1] %v732_v8 }
  0x1e   :  { %1930 = vmatmul.mubr.msk.bf16.gmra.mrb[12].mxu0 %vm134_vm1, %v1997_v9  ;;  %v783_v9 = vsel %vm2179_vm7, 0, %v782_v5 }
  0x1f   :  { %1933 = vmatprep.mubr.msk.bf16.mxu0 %vm134_vm1, %v1998_v10  ;;  %784 = vst [vmem:[#allocation2 + $0x8] sm:$0xf0] %v783_v9 }
  0x26   :  { %1934 = vmatmul.mubr.msk.bf16.gmra.mrb[16].mxu0 %vm134_vm1, %v1999_v11 }
  0x27   :  { %1937 = vmatprep.mubr.msk.bf16.mxu0 %vm134_vm1, %v2000_v12 }
  0x2e   :  { %1938 = vmatmul.mubr.msk.bf16.gmra.mrb[20].mxu0 %vm134_vm1, %v2001_v13 }
  0x2f   :  { %1941 = vmatprep.mubr.msk.bf16.mxu0 %vm134_vm1, %v2002_v14 }
  0x36   :  { %1942 = vmatmul.mubr.msk.bf16.gmra.mrb[24].mxu0 %vm134_vm1, %v2003_v15 }
  0x37   :  { %1945 = vmatprep.mubr.msk.bf16.mxu0 %vm134_vm1, %v2004_v16 }
  0x3e   :  { %1946 = vmatmul.mubr.msk.bf16.gmra.mrb[28].mxu0 %vm134_vm1, %v2005_v17 }
  0xd9   :  { %v2185_v24 = vpop.f32.mrb[0].mxu0 }
  0xda   :  { %v2187_v25 = vpop.f32.mrb[1].mxu0  ;;  %v384_v27 = vrot.slane %v2185_v24, 1  ;;  %v497_v28 = vrot.slane %v2185_v24, 2 }
  0xdb   :  { %v1920_v26 = vpop.f32.mrb[2].mxu0  ;;  %v381_v32 = vrot.slane %v2187_v25, 1  ;;  %v494_v33 = vrot.slane %v2187_v25, 2 }
  0xdc   :  { %v385_v29 = vrot.slane %v1920_v26, 1  ;;  %v498_v30 = vrot.slane %v1920_v26, 2  ;;  %v224_v31 = vpop.f32.mrb[3].mxu0  ;;  %v738_v26 = vsel %vm2173_vm5, 0, %v737_v18 }
  0xdd   :  { %v382_v34 = vrot.slane %v224_v31, 1  ;;  %v495_v35 = vrot.slane %v224_v31, 2  ;;  %739 = vst [vmem:[#allocation2 + $0x18] sm:$0x1] %v738_v26  ;;  %v800_v26 = vld [vmem:[#allocation2 + $0x38] sm:$0xf0] }
  0xde   :  { %v499_v36 = vsel %vm493_vm8, %v497_v28, %v498_v30  ;;  %v386_v37 = vsel %vm380_vm9, %v384_v27, %v385_v29  ;;  %v788_v27 = vld [vmem:[#allocation2 + $0x18] sm:$0xf0] }
  0xdf   :  { %v496_v38 = vsel %vm493_vm8, %v494_v33, %v495_v35  ;;  %v383_v39 = vsel %vm380_vm9, %v381_v32, %v382_v34  ;;  %v789_v31 = vsel %vm2179_vm7, 0, %v788_v27  ;;  %v734_v32 = vld [vmem:[#allocation2 + $0x10] sm:$0x1] }
  0xe0   :  { %542 = vrot.lane.b32.xlu1 %v496_v38, %s2072_s0  ;;  %429 = vrot.lane.b32.xlu0 %v383_v39, %s2073_s1  ;;  %790 = vst [vmem:[#allocation2 + $0x18] sm:$0xf0] %v789_v31  ;;  %v735_v35 = vsel %vm2173_vm5, 0, %v734_v32  ;;  %v797_v31 = vld [vmem:[#allocation2 + $0x30] sm:$0xf0] }
  0xe1   :  { %v2199_v40 = vpop.f32.mrb[4].mxu0  ;;  %736 = vst [vmem:[#allocation2 + $0x10] sm:$0x1] %v735_v35  ;;  %v798_v35 = vsel %vm2179_vm7, 0, %v797_v31  ;;  %v809_v31 = vld [vmem:[#allocation2 + $0x50] sm:$0xf0] }
  0xe2   :  { %v390_v41 = vrot.slane %v2199_v40, 1  ;;  %v503_v42 = vrot.slane %v2199_v40, 2  ;;  %v2203_v43 = vpop.f32.mrb[5].mxu0  ;;  %799 = vst [vmem:[#allocation2 + $0x30] sm:$0xf0] %v798_v35 }
  0xe3   :  { %v1924_v44 = vpop.f32.mrb[6].mxu0  ;;  %v387_v48 = vrot.slane %v2203_v43, 1  ;;  %v500_v49 = vrot.slane %v2203_v43, 2  ;;  %v818_v35 = vld [vmem:[#allocation2 + $0x68] sm:$0xf0] }
  0xe4   :  { %v391_v45 = vrot.slane %v1924_v44, 1  ;;  %v504_v46 = vrot.slane %v1924_v44, 2  ;;  %544 = vrot.lane.b32.xlu1 %v499_v36, %s2072_s0  ;;  %431 = vrot.lane.b32.xlu0 %v386_v37, %s2073_s1  ;;  %v240_v47 = vpop.f32.mrb[7].mxu0  ;;  %v785_v36 = vld [vmem:[#allocation2 + $0x10] sm:$0xf0] }
  0xe5   :  { %v388_v50 = vrot.slane %v240_v47, 1  ;;  %v501_v51 = vrot.slane %v240_v47, 2  ;;  %v786_v39 = vsel %vm2179_vm7, 0, %v785_v36 }
  0xe6   :  { %v392_v52 = vsel %vm380_vm9, %v390_v41, %v391_v45  ;;  %v505_v53 = vsel %vm493_vm8, %v503_v42, %v504_v46  ;;  %787 = vst [vmem:[#allocation2 + $0x10] sm:$0xf0] %v786_v39  ;;  %v2006_v42 = vld [vmem:[%s2810_s3] sm:$0xff]  }
  0xe7   :  { %v389_v54 = vsel %vm380_vm9, %v387_v48, %v388_v50  ;;  %v502_v55 = vsel %vm493_vm8, %v500_v49, %v501_v51  ;;  %1949 = vmatprep.subr.bf16.mxu1 %v2006_v42 }
  0xe8   :  { %435 = vrot.lane.b32.xlu1 %v392_v52, %s2073_s1  ;;  %433 = vrot.lane.b32.xlu0 %v389_v54, %s2073_s1  ;;  %v743_v52 = vld [vmem:[#allocation2 + $0x28] sm:$0x1] }
  0xe9   :  { %v2215_v56 = vpop.f32.mrb[8].mxu0  ;;  %1950 = vmatpush3.bf16.msra.mxu1 %v2006_v42 }
  0xea   :  { %v396_v57 = vrot.slane %v2215_v56, 1  ;;  %v509_v58 = vrot.slane %v2215_v56, 2  ;;  %v2219_v59 = vpop.f32.mrb[9].mxu0  ;;  %1951 = vmatprep.subr.bf16.mxu1 %v2007_v4 }
  0xeb   :  { %v1928_v60 = vpop.f32.mrb[10].mxu0  ;;  %v393_v61 = vrot.slane %v2219_v59, 1  ;;  %v506_v62 = vrot.slane %v2219_v59, 2 }
  0xec   :  { %v397_v63 = vrot.slane %v1928_v60, 1  ;;  %v510_v0 = vrot.slane %v1928_v60, 2  ;;  %548 = vrot.lane.b32.xlu1 %v505_v53, %s2072_s0  ;;  %546 = vrot.lane.b32.xlu0 %v502_v55, %s2072_s0  ;;  %v256_v1 = vpop.f32.mrb[11].mxu0 }
  0xed   :  { %v394_v2 = vrot.slane %v256_v1, 1  ;;  %v507_v3 = vrot.slane %v256_v1, 2  ;;  %1952 = vmatpush3.bf16.msra.mxu1 %v2007_v4 }
  0xee   :  { %v398_v6 = vsel %vm380_vm9, %v396_v57, %v397_v63  ;;  %v511_v7 = vsel %vm493_vm8, %v509_v58, %v510_v0  ;;  %v744_v57 = vsel %vm2173_vm5, 0, %v743_v52  ;;  %v791_v63 = vld [vmem:[#allocation2 + $0x20] sm:$0xf0] }
  0xef   :  { %v395_v10 = vsel %vm380_vm9, %v393_v61, %v394_v2  ;;  %v508_v11 = vsel %vm493_vm8, %v506_v62, %v507_v3  ;;  %745 = vst [vmem:[#allocation2 + $0x28] sm:$0x1] %v744_v57  ;;  %v794_v61 = vld [vmem:[#allocation2 + $0x28] sm:$0xf0]  ;;  %v740_v62 = vld [vmem:[#allocation2 + $0x20] sm:$0x1] }
  0xf0   :  { %439 = vrot.lane.b32.xlu1 %v398_v6, %s2073_s1  ;;  %437 = vrot.lane.b32.xlu0 %v395_v10, %s2073_s1  ;;  %v795_v2 = vsel %vm2179_vm7, 0, %v794_v61  ;;  %v741_v3 = vsel %vm2173_vm5, 0, %v740_v62  ;;  %v792_v5 = vsel %vm2179_vm7, 0, %v791_v63  ;;  %v752_v62 = vld [vmem:[#allocation2 + $0x40] sm:$0x1] }
  0xf1   :  { %v2235_v12 = vpop.f32.mrb[12].mxu0  ;;  %796 = vst [vmem:[#allocation2 + $0x28] sm:$0xf0] %v795_v2  ;;  %742 = vst [vmem:[#allocation2 + $0x20] sm:$0x1] %v741_v3  ;;  %v753_v63 = vsel %vm2173_vm5, 0, %v752_v62 }
  0xf2   :  { %v402_v13 = vrot.slane %v2235_v12, 1  ;;  %v515_v14 = vrot.slane %v2235_v12, 2  ;;  %v2239_v15 = vpop.f32.mrb[13].mxu0  ;;  %793 = vst [vmem:[#allocation2 + $0x20] sm:$0xf0] %v792_v5 }
  0xf3   :  { %v399_v16 = vrot.slane %v2239_v15, 1  ;;  %v1932_v17 = vpop.f32.mrb[14].mxu0  ;;  %v512_v28 = vrot.slane %v2239_v15, 2  ;;  %754 = vst [vmem:[#allocation2 + $0x40] sm:$0x1] %v753_v63 }
  0xf4   :  { %v403_v20 = vrot.slane %v1932_v17, 1  ;;  %v516_v21 = vrot.slane %v1932_v17, 2  ;;  %552 = vrot.lane.b32.xlu1 %v511_v7, %s2072_s0  ;;  %550 = vrot.lane.b32.xlu0 %v508_v11, %s2072_s0  ;;  %v272_v23 = vpop.f32.mrb[15].mxu0  ;;  %v749_v17 = vld [vmem:[#allocation2 + $0x38] sm:$0x1] }
  0xf5   :  { %v400_v29 = vrot.slane %v272_v23, 1  ;;  %v513_v30 = vrot.slane %v272_v23, 2  ;;  %v750_v23 = vsel %vm2173_vm5, 0, %v749_v17 }
  0xf6   :  { %v404_v33 = vsel %vm380_vm9, %v402_v13, %v403_v20  ;;  %v517_v34 = vsel %vm493_vm8, %v515_v14, %v516_v21  ;;  %751 = vst [vmem:[#allocation2 + $0x38] sm:$0x1] %v750_v23 }
  0xf7   :  { %v401_v37 = vsel %vm380_vm9, %v399_v16, %v400_v29  ;;  %v514_v38 = vsel %vm493_vm8, %v512_v28, %v513_v30  ;;  %v801_v29 = vsel %vm2179_vm7, 0, %v800_v26  ;;  %v746_v30 = vld [vmem:[#allocation2 + $0x30] sm:$0x1]  ;;  %v761_v26 = vld [vmem:[#allocation2 + $0x58] sm:$0x1] }
  0xf8   :  { %443 = vrot.lane.b32.xlu1 %v404_v33, %s2073_s1  ;;  %441 = vrot.lane.b32.xlu0 %v401_v37, %s2073_s1  ;;  %802 = vst [vmem:[#allocation2 + $0x38] sm:$0xf0] %v801_v29 }
  0xf9   :  { %v2259_v41 = vpop.f32.mrb[16].mxu0 }
  0xfa   :  { %v408_v44 = vrot.slane %v2259_v41, 1  ;;  %v521_v45 = vrot.slane %v2259_v41, 2  ;;  %v2266_v46 = vpop.f32.mrb[17].mxu0 }
  0xfb   :  { %v1936_v47 = vpop.f32.mrb[18].mxu0  ;;  %v405_v48 = vrot.slane %v2266_v46, 1  ;;  %v518_v53 = vrot.slane %v2266_v46, 2 }
  0xfc   :  { %v409_v49 = vrot.slane %v1936_v47, 1  ;;  %v522_v50 = vrot.slane %v1936_v47, 2  ;;  %556 = vrot.lane.b32.xlu1 %v517_v34, %s2072_s0  ;;  %554 = vrot.lane.b32.xlu0 %v514_v38, %s2072_s0  ;;  %v288_v51 = vpop.f32.mrb[19].mxu0  ;;  %v747_v34 = vsel %vm2173_vm5, 0, %v746_v30  ;;  %v758_v30 = vld [vmem:[#allocation2 + $0x50] sm:$0x1] }
  0xfd   :  { %v406_v54 = vrot.slane %v288_v51, 1  ;;  %v519_v55 = vrot.slane %v288_v51, 2  ;;  %748 = vst [vmem:[#allocation2 + $0x30] sm:$0x1] %v747_v34  ;;  %v767_v34 = vld [vmem:[#allocation2 + $0x68] sm:$0x1] }
  0xfe   :  { %v410_v58 = vsel %vm380_vm9, %v408_v44, %v409_v49  ;;  %v523_v60 = vsel %vm493_vm8, %v521_v45, %v522_v50 }
  0xff   :  { %v407_v0 = vsel %vm380_vm9, %v405_v48, %v406_v54  ;;  %v520_v1 = vsel %vm493_vm8, %v518_v53, %v519_v55  ;;  %v755_v54 = vld [vmem:[#allocation2 + $0x48] sm:$0x1]  ;;  %v806_v55 = vld [vmem:[#allocation2 + $0x48] sm:$0xf0] }
 0x100   :  { %447 = vrot.lane.b32.xlu1 %v410_v58, %s2073_s1  ;;  %445 = vrot.lane.b32.xlu0 %v407_v0, %s2073_s1  ;;  %v807_v61 = vsel %vm2179_vm7, 0, %v806_v55  ;;  %v803_v0 = vld [vmem:[#allocation2 + $0x40] sm:$0xf0] }
 0x101   :  { %v2289_v6 = vpop.f32.mrb[20].mxu0  ;;  %808 = vst [vmem:[#allocation2 + $0x48] sm:$0xf0] %v807_v61  ;;  %v804_v2 = vsel %vm2179_vm7, 0, %v803_v0  ;;  %v2383_v61 = vld [vmem:[%s2811_s2] ss:$0 sm:$0xff] }
 0x102   :  { %v414_v7 = vrot.slane %v2289_v6, 1  ;;  %v527_v8 = vrot.slane %v2289_v6, 2  ;;  %v2293_v9 = vpop.f32.mrb[21].mxu0  ;;  %805 = vst [vmem:[#allocation2 + $0x40] sm:$0xf0] %v804_v2  ;;  %s2074_s2 = smov 120  }
 0x103   :  { %v1940_v10 = vpop.f32.mrb[22].mxu0  ;;  %v411_v11 = vrot.slane %v2293_v9, 1  ;;  %v524_v18 = vrot.slane %v2293_v9, 2 }
 0x104   :  { %v415_v13 = vrot.slane %v1940_v10, 1  ;;  %v528_v14 = vrot.slane %v1940_v10, 2  ;;  %560 = vrot.lane.b32.xlu1 %v523_v60, %s2072_s0  ;;  %558 = vrot.lane.b32.xlu0 %v520_v1, %s2072_s0  ;;  %v304_v16 = vpop.f32.mrb[23].mxu0  ;;  %v756_v60 = vsel %vm2173_vm5, 0, %v755_v54 }
 0x105   :  { %v412_v20 = vrot.slane %v304_v16, 1  ;;  %v525_v21 = vrot.slane %v304_v16, 2  ;;  %757 = vst [vmem:[#allocation2 + $0x48] sm:$0x1] %v756_v60 }
 0x106   :  { %v416_v27 = vsel %vm380_vm9, %v414_v7, %v415_v13  ;;  %v529_v28 = vsel %vm493_vm8, %v527_v8, %v528_v14 }
 0x107   :  { %v413_v32 = vsel %vm380_vm9, %v411_v11, %v412_v20  ;;  %v526_v33 = vsel %vm493_vm8, %v524_v18, %v525_v21 }
 0x108   :  { %451 = vrot.lane.b32.xlu1 %v416_v27, %s2073_s1  ;;  %449 = vrot.lane.b32.xlu0 %v413_v32, %s2073_s1  ;;  %v812_v27 = vld [vmem:[#allocation2 + $0x58] sm:$0xf0]  ;;  %v759_v32 = vsel %vm2173_vm5, 0, %v758_v30 }
 0x109   :  { %v2313_v36 = vpop.f32.mrb[24].mxu0  ;;  %v813_v29 = vsel %vm2179_vm7, 0, %v812_v27  ;;  %760 = vst [vmem:[#allocation2 + $0x50] sm:$0x1] %v759_v32 }
 0x10a   :  { %v420_v37 = vrot.slane %v2313_v36, 1  ;;  %v533_v38 = vrot.slane %v2313_v36, 2  ;;  %v2317_v39 = vpop.f32.mrb[25].mxu0  ;;  %814 = vst [vmem:[#allocation2 + $0x58] sm:$0xf0] %v813_v29 }
 0x10b   :  { %v417_v42 = vrot.slane %v2317_v39, 1  ;;  %v530_v44 = vrot.slane %v2317_v39, 2  ;;  %v1944_v45 = vpop.f32.mrb[26].mxu0 }
 0x10c   :  { %v421_v47 = vrot.slane %v1944_v45, 1  ;;  %v534_v48 = vrot.slane %v1944_v45, 2  ;;  %564 = vrot.lane.b32.xlu1 %v529_v28, %s2072_s0  ;;  %562 = vrot.lane.b32.xlu0 %v526_v33, %s2072_s0  ;;  %v320_v49 = vpop.f32.mrb[27].mxu0  ;;  %v762_v28 = vsel %vm2173_vm5, 0, %v761_v26  ;;  %v810_v33 = vsel %vm2179_vm7, 0, %v809_v31 }
 0x10d   :  { %v418_v50 = vrot.slane %v320_v49, 1  ;;  %v531_v51 = vrot.slane %v320_v49, 2  ;;  %763 = vst [vmem:[#allocation2 + $0x58] sm:$0x1] %v762_v28  ;;  %811 = vst [vmem:[#allocation2 + $0x50] sm:$0xf0] %v810_v33 }
 0x10e   :  { %v422_v52 = vsel %vm380_vm9, %v420_v37, %v421_v47  ;;  %v535_v53 = vsel %vm493_vm8, %v533_v38, %v534_v48  ;;  %v764_v37 = vld [vmem:[#allocation2 + $0x60] sm:$0x1]  ;;  %v768_v38 = vsel %vm2173_vm5, 0, %v767_v34  ;;  %v815_v45 = vld [vmem:[#allocation2 + $0x60] sm:$0xf0] }
 0x10f   :  { %v419_v57 = vsel %vm380_vm9, %v417_v42, %v418_v50  ;;  %v532_v58 = vsel %vm493_vm8, %v530_v44, %v531_v51  ;;  %v819_v42 = vsel %vm2179_vm7, 0, %v818_v35  ;;  %v765_v44 = vsel %vm2173_vm5, 0, %v764_v37  ;;  %769 = vst [vmem:[#allocation2 + $0x68] sm:$0x1] %v768_v38  ;;  %v773_v48 = vld [vmem:[#allocation2 + $0x78] sm:$0x1] }
 0x110   :  { %455 = vrot.lane.b32.xlu1 %v422_v52, %s2073_s1  ;;  %453 = vrot.lane.b32.xlu0 %v419_v57, %s2073_s1  ;;  %820 = vst [vmem:[#allocation2 + $0x68] sm:$0xf0] %v819_v42  ;;  %766 = vst [vmem:[#allocation2 + $0x60] sm:$0x1] %v765_v44  ;;  %v816_v47 = vsel %vm2179_vm7, 0, %v815_v45  ;;  %v774_v50 = vsel %vm2173_vm5, 0, %v773_v48 }
 0x111   :  { %v2335_v1 = vpop.f32.mrb[28].mxu0  ;;  %817 = vst [vmem:[#allocation2 + $0x60] sm:$0xf0] %v816_v47  ;;  %v824_v49 = vld [vmem:[#allocation2 + $0x78] sm:$0xf0] }
 0x112   :  { %v426_v3 = vrot.slane %v2335_v1, 1  ;;  %v539_v4 = vrot.slane %v2335_v1, 2  ;;  %v2341_v5 = vpop.f32.mrb[29].mxu0  ;;  %v825_v51 = vsel %vm2179_vm7, 0, %v824_v49  ;;  %v770_v52 = vld [vmem:[#allocation2 + $0x70] sm:$0x1] }
 0x113   :  { %v423_v7 = vrot.slane %v2341_v5, 1  ;;  %v536_v8 = vrot.slane %v2341_v5, 2  ;;  %v1948_v10 = vpop.f32.mrb[30].mxu0  ;;  %775 = vst [vmem:[#allocation2 + $0x78] sm:$0x1] %v774_v50  ;;  %v771_v54 = vsel %vm2173_vm5, 0, %v770_v52 }
 0x114   :  { %v427_v11 = vrot.slane %v1948_v10, 1  ;;  %v540_v13 = vrot.slane %v1948_v10, 2  ;;  %568 = vrot.lane.b32.xlu1 %v535_v53, %s2072_s0  ;;  %566 = vrot.lane.b32.xlu0 %v532_v58, %s2072_s0  ;;  %v336_v14 = vpop.f32.mrb[31].mxu0  ;;  %v821_v53 = vld [vmem:[#allocation2 + $0x70] sm:$0xf0] }
 0x115   :  { %v424_v16 = vrot.slane %v336_v14, 1  ;;  %v537_v17 = vrot.slane %v336_v14, 2  ;;  %826 = vst [vmem:[#allocation2 + $0x78] sm:$0xf0] %v825_v51  ;;  %v822_v55 = vsel %vm2179_vm7, 0, %v821_v53 }
 0x116   :  { %v428_v18 = vsel %vm380_vm9, %v426_v3, %v427_v11  ;;  %v541_v20 = vsel %vm493_vm8, %v539_v4, %v540_v13  ;;  %772 = vst [vmem:[#allocation2 + $0x70] sm:$0x1] %v771_v54  ;;  %823 = vst [vmem:[#allocation2 + $0x70] sm:$0xf0] %v822_v55 }
 0x117   :  { %v425_v21 = vsel %vm380_vm9, %v423_v7, %v424_v16  ;;  %v538_v23 = vsel %vm493_vm8, %v536_v8, %v537_v17 }
 0x118   :  { %459 = vrot.lane.b32.xlu1 %v428_v18, %s2073_s1  ;;  %457 = vrot.lane.b32.xlu0 %v425_v21, %s2073_s1 }
 0x11c   :  { %572 = vrot.lane.b32.xlu1 %v541_v20, %s2072_s0  ;;  %570 = vrot.lane.b32.xlu0 %v538_v23, %s2072_s0 }
 0x152   :  { %v543_v57 = vpop.permute.xlu1 %542  ;;  %v430_v58 = vpop.permute.xlu0 %429 }
 0x153   :  { %v477_v60 = vadd.f32 %v430_v58, %v2187_v25 }
 0x155   :  { %v590_v62 = vadd.f32 %v543_v57, %v477_v60 }
 0x156   :  { %v545_v63 = vpop.permute.xlu1 %544  ;;  %v432_v0 = vpop.permute.xlu0 %431 }
 0x157   :  { %v613_v19 = vadd.f32 %v2383_v61, %v590_v62  ;;  %v478_v2 = vadd.f32 %v2185_v24, %v432_v0 }
 0x159   :  { %v645_v22 = vmin.f32 %v613_v19, 0.0  ;;  %v591_v3 = vadd.f32 %v545_v63, %v478_v2  ;;  %vm629_vm10 = vcmp.gt.f32.partialorder %v613_v19, 0.0 }
 0x15a   :  { %v436_v4 = vpop.permute.xlu1 %435  ;;  %v434_v7 = vpop.permute.xlu0 %433 }
 0x15b   :  { %v661_v8 = vmul.f32 1.442695, %v645_v22  ;;  %v614_v10 = vadd.f32 %v2383_v61, %v591_v3  ;;  %v480_v11 = vadd.f32 %v2199_v40, %v436_v4  ;;  %v479_v13 = vadd.f32 %v434_v7, %v2203_v43  ;;  %v974_v22 = vld [vmem:[#allocation2] sm:$0x1f] }
 0x15d   :  { %2008 = vpow2.f32 %v661_v8  ;;  %v646_v25 = vmin.f32 %v614_v10, 0.0  ;;  %vm630_vm13 = vcmp.gt.f32.partialorder %v614_v10, 0.0 }
 0x15e   :  { %v549_v14 = vpop.permute.xlu1 %548  ;;  %v547_v16 = vpop.permute.xlu0 %546 }
 0x15f   :  { %v663_v17 = vmul.f32 1.442695, %v646_v25  ;;  %v593_v18 = vadd.f32 %v549_v14, %v480_v11  ;;  %v592_v20 = vadd.f32 %v547_v16, %v479_v13 }
 0x161   :  { %2010 = vpow2.f32 %v663_v17  ;;  %v2391_v24 = vadd.f32 %v2383_v61, %v593_v18  ;;  %v2394_v21 = vadd.f32 %v2383_v61, %v592_v20  ;;  %v977_v20 = vld [vmem:[#allocation2 + $0x8] sm:$0x1f] }
 0x162   :  { %v440_v23 = vpop.permute.xlu1 %439  ;;  %v438_v26 = vpop.permute.xlu0 %437 }
 0x163   :  { %v648_v27 = vmin.f32 %v2391_v24, 0.0  ;;  %v647_v40 = vmin.f32 %v2394_v21, 0.0  ;;  %v482_v29 = vadd.f32 %v2215_v56, %v440_v23  ;;  %v481_v30 = vadd.f32 %v438_v26, %v2219_v59 }
 0x164   :  { %vm632_vm15 = vcmp.gt.f32.partialorder %v2391_v24, 0.0  ;;  %vm631_vm0 = vcmp.gt.f32.partialorder %v2394_v21, 0.0 }
 0x165   :  { %v667_v28 = vmul.f32 1.442695, %v648_v27  ;;  %v665_v43 = vmul.f32 1.442695, %v647_v40 }
 0x166   :  { %v553_v31 = vpop.permute.xlu1 %552  ;;  %v551_v32 = vpop.permute.xlu0 %550 }
 0x167   :  { %v2009_v33 = vpop.eup %2008  ;;  %2012 = vpow2.f32 %v667_v28  ;;  %v595_v34 = vadd.f32 %v553_v31, %v482_v29  ;;  %v594_v35 = vadd.f32 %v551_v32, %v481_v30 }
 0x168   :  { %v1829_v37 = vadd.f32 -1.0, %v2009_v33  ;;  %2014 = vpow2.f32 %v665_v43 }
 0x169   :  { %v2401_v38 = vadd.f32 %v2383_v61, %v595_v34  ;;  %v2404_v42 = vadd.f32 %v2383_v61, %v594_v35 }
 0x16a   :  { %v709_v44 = vsel %vm629_vm10, %v613_v19, %v1829_v37  ;;  %v444_v45 = vpop.permute.xlu1 %443  ;;  %v442_v56 = vpop.permute.xlu0 %441 }
 0x16b   :  { %v2011_v47 = vpop.eup %2010  ;;  %v827_v59 = vpack.c.bf16 %v709_v44, %v709_v44  ;;  %v650_v48 = vmin.f32 %v2401_v38, 0.0  ;;  %v649_v50 = vmin.f32 %v2404_v42, 0.0  ;;  %v484_v53 = vadd.f32 %v2235_v12, %v444_v45 }
 0x16c   :  { %v1830_v49 = vadd.f32 -1.0, %v2011_v47  ;;  %v483_v58 = vadd.f32 %v442_v56, %v2239_v15  ;;  %vm634_vm3 = vcmp.gt.f32.partialorder %v2401_v38, 0.0  ;;  %vm633_vm4 = vcmp.gt.f32.partialorder %v2404_v42, 0.0 }
 0x16d   :  { %v844_v51 = vshrl.u32 %v827_v59, 16  ;;  %v671_v52 = vmul.f32 1.442695, %v650_v48  ;;  %v847_v54 = vshll.u32 %v827_v59, 16  ;;  %v669_v57 = vmul.f32 1.442695, %v649_v50 }
 0x16e   :  { %v710_v55 = vsel %vm630_vm13, %v614_v10, %v1830_v49  ;;  %v557_v60 = vpop.permute.xlu1 %556  ;;  %v555_v62 = vpop.permute.xlu0 %554  ;;  %v983_v48 = vld [vmem:[#allocation2 + $0x18] sm:$0x1f] }
 0x16f   :  { %v846_v63 = vrot.slane %v844_v51, 7  ;;  %v828_v0 = vpack.c.bf16 %v710_v55, %v710_v55  ;;  %2016 = vpow2.f32 %v671_v52  ;;  %v597_v19 = vadd.f32 %v557_v60, %v484_v53 }
 0x170   :  { %2018 = vpow2.f32 %v669_v57  ;;  %v596_v12 = vadd.f32 %v555_v62, %v483_v58  ;;  %v980_v57 = vld [vmem:[#allocation2 + $0x10] sm:$0x1f] }
 0x171   :  { %v2013_v3 = vpop.eup %2012  ;;  %v849_v4 = vor.u32 %v847_v54, %v846_v63  ;;  %v851_v7 = vshrl.u32 %v828_v0, 16  ;;  %v2417_v15 = vadd.f32 %v2383_v61, %v597_v19  ;;  %v854_v17 = vshll.u32 %v828_v0, 16 }
 0x172   :  { %v2015_v8 = vpop.eup %2014  ;;  %v1832_v10 = vadd.f32 -1.0, %v2013_v3  ;;  %v2421_v25 = vadd.f32 %v2383_v61, %v596_v12  ;;  %v448_v11 = vpop.permute.xlu1 %447 }
 0x173   :  { %v446_v13 = vpop.permute.xlu0 %445  ;;  %v975_v14 = vsel %vm2412_vm14, %v849_v4, %v974_v22  ;;  %v853_v16 = vrot.slane %v851_v7, 7  ;;  %v1831_v18 = vadd.f32 -1.0, %v2015_v8  ;;  %v652_v26 = vmin.f32 %v2417_v15, 0.0 }
 0x174   :  { %976 = vst [vmem:[#allocation2] sm:$0x1f] %v975_v14  ;;  %v712_v23 = vsel %vm632_vm15, %v2391_v24, %v1832_v10  ;;  %v651_v27 = vmin.f32 %v2421_v25, 0.0  ;;  %v486_v29 = vadd.f32 %v2259_v41, %v448_v11  ;;  %v485_v33 = vadd.f32 %v446_v13, %v2266_v46 }
 0x175   :  { %v856_v40 = vor.u32 %v854_v17, %v853_v16  ;;  %v830_v28 = vpack.c.bf16 %v712_v23, %v712_v23  ;;  %v711_v43 = vsel %vm631_vm0, %v2394_v21, %v1831_v18  ;;  %v675_v31 = vmul.f32 1.442695, %v652_v26 }
 0x176   :  { %v829_v30 = vpack.c.bf16 %v711_v43, %v711_v43  ;;  %v673_v32 = vmul.f32 1.442695, %v651_v27  ;;  %v561_v34 = vpop.permute.xlu1 %560  ;;  %vm636_vm5 = vcmp.gt.f32.partialorder %v2417_v15, 0.0  ;;  %vm635_vm6 = vcmp.gt.f32.partialorder %v2421_v25, 0.0 }
 0x177   :  { %v559_v35 = vpop.permute.xlu0 %558  ;;  %v978_v24 = vsel %vm2412_vm14, %v856_v40, %v977_v20  ;;  %v865_v37 = vshrl.u32 %v830_v28, 16  ;;  %v599_v44 = vadd.f32 %v561_v34, %v486_v29  ;;  %2020 = vpow2.f32 %v675_v31  ;;  %v989_v40 = vld [vmem:[#allocation2 + $0x28] sm:$0x1f] }
 0x178   :  { %979 = vst [vmem:[#allocation2 + $0x8] sm:$0x1f] %v978_v24  ;;  %v858_v45 = vshrl.u32 %v829_v30, 16  ;;  %v598_v56 = vadd.f32 %v559_v35, %v485_v33  ;;  %v868_v41 = vshll.u32 %v830_v28, 16  ;;  %2022 = vpow2.f32 %v673_v32  ;;  %v986_v32 = vld [vmem:[#allocation2 + $0x20] sm:$0x1f] }
 0x179   :  { %v2017_v21 = vpop.eup %2016  ;;  %v867_v47 = vrot.slane %v865_v37, 7  ;;  %v2435_v59 = vadd.f32 %v2383_v61, %v599_v44  ;;  %v861_v50 = vshll.u32 %v829_v30, 16 }
 0x17a   :  { %v2019_v46 = vpop.eup %2018  ;;  %v860_v49 = vrot.slane %v858_v45, 7  ;;  %v1834_v51 = vadd.f32 -1.0, %v2017_v21  ;;  %v2438_v52 = vadd.f32 %v2383_v61, %v598_v56  ;;  %v452_v53 = vpop.permute.xlu1 %451 }
 0x17b   :  { %v450_v54 = vpop.permute.xlu0 %449  ;;  %v870_v55 = vor.u32 %v868_v41, %v867_v47  ;;  %v1833_v58 = vadd.f32 -1.0, %v2019_v46  ;;  %v654_v60 = vmin.f32 %v2435_v59, 0.0  ;;  %v1022_v62 = vld [vmem:[#allocation2] sm:$0xff]  ;;  %vm638_vm7 = vcmp.gt.f32.partialorder %v2435_v59, 0.0 }
 0x17c   :  { %v863_v63 = vor.u32 %v861_v50, %v860_v49  ;;  %v714_v0 = vsel %vm634_vm3, %v2401_v38, %v1834_v51  ;;  %v653_v19 = vmin.f32 %v2438_v52, 0.0  ;;  %1953 = vmatprep.mubr.msk.bf16.mxu1 %vm1054_vm2, %v1022_v62  ;;  %v488_v38 = vadd.f32 %v2289_v6, %v452_v53 }
 0x17d   :  { %v984_v22 = vsel %vm2412_vm14, %v870_v55, %v983_v48  ;;  %v832_v12 = vpack.c.bf16 %v714_v0, %v714_v0  ;;  %v713_v3 = vsel %vm633_vm4, %v2404_v42, %v1833_v58  ;;  %v679_v4 = vmul.f32 1.442695, %v654_v60 }
 0x17e   :  { %985 = vst [vmem:[#allocation2 + $0x18] sm:$0x1f] %v984_v22  ;;  %v981_v7 = vsel %vm2412_vm14, %v863_v63, %v980_v57  ;;  %v831_v8 = vpack.c.bf16 %v713_v3, %v713_v3  ;;  %v677_v10 = vmul.f32 1.442695, %v653_v19  ;;  %v565_v11 = vpop.permute.xlu1 %564  ;;  %v487_v16 = vadd.f32 %v450_v54, %v2293_v9 }
 0x17f   :  { %v563_v13 = vpop.permute.xlu0 %562  ;;  %982 = vst [vmem:[#allocation2 + $0x10] sm:$0x1f] %v981_v7  ;;  %v879_v14 = vshrl.u32 %v832_v12, 16  ;;  %2024 = vpow2.f32 %v679_v4  ;;  %v1023_v17 = vld [vmem:[#allocation2 + $0x8] sm:$0xff]  ;;  %v601_v42 = vadd.f32 %v565_v11, %v488_v38  ;;  %v882_v23 = vshll.u32 %v832_v12, 16 }
 0x180   :  { %v872_v18 = vshrl.u32 %v831_v8, 16  ;;  %2026 = vpow2.f32 %v677_v10  ;;  %1954 = vmatmul.mubr.msk.bf16.vlgmr.msra.gmra.mrb[0].mxu1 %vm1054_vm2, %v1023_v17  ;;  %v600_v26 = vadd.f32 %v563_v13, %v487_v16  ;;  %v875_v6 = vshll.u32 %v831_v8, 16  ;;  %v995_v4 = vld [vmem:[#allocation2 + $0x38] sm:$0x1f]  ;;  %v992_v11 = vld [vmem:[#allocation2 + $0x30] sm:$0x1f] }
 0x181   :  { %v881_v20 = vrot.slane %v879_v14, 7  ;;  %v2021_v27 = vpop.eup %2020  ;;  %v2455_v43 = vadd.f32 %v2383_v61, %v601_v42  ;;  %vm637_vm10 = vcmp.gt.f32.partialorder %v2438_v52, 0.0 }
 0x182   :  { %v874_v28 = vrot.slane %v872_v18, 7  ;;  %v456_v29 = vpop.permute.xlu1 %455  ;;  %v2023_v31 = vpop.eup %2022  ;;  %v1836_v33 = vadd.f32 -1.0, %v2021_v27  ;;  %v2459_v34 = vadd.f32 %v2383_v61, %v600_v26 }
 0x183   :  { %v454_v30 = vpop.permute.xlu0 %453  ;;  %v884_v9 = vor.u32 %v882_v23, %v881_v20  ;;  %v1835_v24 = vadd.f32 -1.0, %v2023_v31  ;;  %v656_v37 = vmin.f32 %v2455_v43, 0.0  ;;  %v490_v21 = vadd.f32 %v2313_v36, %v456_v29 }
 0x184   :  { %v877_v35 = vor.u32 %v875_v6, %v874_v28  ;;  %v716_v45 = vsel %vm636_vm5, %v2417_v15, %v1836_v33  ;;  %v655_v56 = vmin.f32 %v2459_v34, 0.0  ;;  %v489_v36 = vadd.f32 %v454_v30, %v2317_v39 }
 0x185   :  { %v990_v44 = vsel %vm2412_vm14, %v884_v9, %v989_v40  ;;  %v834_v41 = vpack.c.bf16 %v716_v45, %v716_v45  ;;  %v715_v46 = vsel %vm635_vm6, %v2421_v25, %v1835_v24  ;;  %v683_v48 = vmul.f32 1.442695, %v656_v37  ;;  %v1025_v55 = vld [vmem:[#allocation2 + $0x18] sm:$0xff]  ;;  %v1001_v37 = vld [vmem:[#allocation2 + $0x48] sm:$0x1f] }
 0x186   :  { %991 = vst [vmem:[#allocation2 + $0x28] sm:$0x1f] %v990_v44  ;;  %v987_v47 = vsel %vm2412_vm14, %v877_v35, %v986_v32  ;;  %v1024_v49 = vld [vmem:[#allocation2 + $0x10] sm:$0xff]  ;;  %v569_v50 = vpop.permute.xlu1 %568  ;;  %v833_v53 = vpack.c.bf16 %v715_v46, %v715_v46  ;;  %v681_v54 = vmul.f32 1.442695, %v655_v56  ;;  %vm640_vm11 = vcmp.gt.f32.partialorder %v2455_v43, 0.0 }
 0x187   :  { %v567_v51 = vpop.permute.xlu0 %566  ;;  %988 = vst [vmem:[#allocation2 + $0x20] sm:$0x1f] %v987_v47  ;;  %1957 = vmatprep.mubr.msk.bf16.mxu1 %vm1054_vm2, %v1024_v49  ;;  %v603_v15 = vadd.f32 %v569_v50, %v490_v21  ;;  %v893_v57 = vshrl.u32 %v834_v41, 16  ;;  %2028 = vpow2.f32 %v683_v48  ;;  %v896_v0 = vshll.u32 %v834_v41, 16  ;;  %v998_v47 = vld [vmem:[#allocation2 + $0x40] sm:$0x1f] }
 0x188   :  { %1958 = vmatmul.mubr.msk.bf16.gmra.mrb[4].mxu1 %vm1054_vm2, %v1025_v55  ;;  %v886_v60 = vshrl.u32 %v833_v53, 16  ;;  %2030 = vpow2.f32 %v681_v54  ;;  %v602_v22 = vadd.f32 %v567_v51, %v489_v36  ;;  %v889_v39 = vshll.u32 %v833_v53, 16 }
 0x189   :  { %v2025_v58 = vpop.eup %2024  ;;  %v2476_v25 = vadd.f32 %v2383_v61, %v603_v15  ;;  %v895_v63 = vrot.slane %v893_v57, 7  ;;  %vm639_vm12 = vcmp.gt.f32.partialorder %v2459_v34, 0.0  ;;  %vm1769_vm6 = vcmask 1042434  }
 0x18a   :  { %v2027_v62 = vpop.eup %2026  ;;  %v1838_v19 = vadd.f32 -1.0, %v2025_v58  ;;  %v460_v12 = vpop.permute.xlu1 %459  ;;  %v888_v7 = vrot.slane %v886_v60, 7  ;;  %v2484_v14 = vadd.f32 %v2383_v61, %v602_v22 }
 0x18b   :  { %v458_v3 = vpop.permute.xlu0 %457  ;;  %v1837_v8 = vadd.f32 -1.0, %v2027_v62  ;;  %v658_v10 = vmin.f32 %v2476_v25, 0.0  ;;  %v898_v38 = vor.u32 %v896_v0, %v895_v63  ;;  %v492_v6 = vadd.f32 %v2335_v1, %v460_v12 }
 0x18c   :  { %v718_v13 = vsel %vm638_vm7, %v2435_v59, %v1838_v19  ;;  %v891_v16 = vor.u32 %v889_v39, %v888_v7  ;;  %v657_v26 = vmin.f32 %v2484_v14, 0.0  ;;  %v491_v9 = vadd.f32 %v458_v3, %v2341_v5 }
 0x18d   :  { %v836_v17 = vpack.c.bf16 %v718_v13, %v718_v13  ;;  %v717_v18 = vsel %vm637_vm10, %v2438_v52, %v1837_v8  ;;  %v687_v42 = vmul.f32 1.442695, %v658_v10  ;;  %v996_v20 = vsel %vm2412_vm14, %v898_v38, %v995_v4  ;;  %v1027_v29 = vld [vmem:[#allocation2 + $0x28] sm:$0xff]  ;;  %v1004_v8 = vld [vmem:[#allocation2 + $0x50] sm:$0x1f] }
 0x18e   :  { %v835_v23 = vpack.c.bf16 %v717_v18, %v717_v18  ;;  %v1026_v27 = vld [vmem:[#allocation2 + $0x20] sm:$0xff]  ;;  %v573_v40 = vpop.permute.xlu1 %572  ;;  %997 = vst [vmem:[#allocation2 + $0x38] sm:$0x1f] %v996_v20  ;;  %v993_v59 = vsel %vm2412_vm14, %v891_v16, %v992_v11  ;;  %v685_v31 = vmul.f32 1.442695, %v657_v26  ;;  %vm642_vm13 = vcmp.gt.f32.partialorder %v2476_v25, 0.0 }
 0x18f   :  { %v907_v28 = vshrl.u32 %v836_v17, 16  ;;  %2032 = vpow2.f32 %v687_v42  ;;  %1961 = vmatprep.mubr.msk.bf16.mxu1 %vm1054_vm2, %v1026_v27  ;;  %v571_v52 = vpop.permute.xlu0 %570  ;;  %994 = vst [vmem:[#allocation2 + $0x30] sm:$0x1f] %v993_v59  ;;  %v910_v33 = vshll.u32 %v836_v17, 16  ;;  %v605_v35 = vadd.f32 %v573_v40, %v492_v6  ;;  %v1013_v40 = vld [vmem:[#allocation2 + $0x68] sm:$0x1f] }
 0x190   :  { %v900_v30 = vshrl.u32 %v835_v23, 16  ;;  %1962 = vmatmul.mubr.msk.bf16.gmra.mrb[8].mxu1 %vm1054_vm2, %v1027_v29  ;;  %v903_v45 = vshll.u32 %v835_v23, 16  ;;  %2034 = vpow2.f32 %v685_v31  ;;  %v604_v1 = vadd.f32 %v571_v52, %v491_v9  ;;  %v1010_v9 = vld [vmem:[#allocation2 + $0x60] sm:$0x1f] }
 0x191   :  { %v909_v32 = vrot.slane %v907_v28, 7  ;;  %v2029_v24 = vpop.eup %2028  ;;  %v2497_v46 = vadd.f32 %v2383_v61, %v605_v35  ;;  %vm641_vm15 = vcmp.gt.f32.partialorder %v2484_v14, 0.0  ;;  %vm1771_vm7 = vcmask 1043459  }
 0x192   :  { %v902_v44 = vrot.slane %v900_v30, 7  ;;  %v2031_v56 = vpop.eup %2030  ;;  %v1840_v41 = vadd.f32 -1.0, %v2029_v24  ;;  %v2501_v49 = vadd.f32 %v2383_v61, %v604_v1 }
 0x193   :  { %v912_v21 = vor.u32 %v910_v33, %v909_v32  ;;  %v1839_v5 = vadd.f32 -1.0, %v2031_v56  ;;  %v660_v53 = vmin.f32 %v2497_v46, 0.0  ;;  %vm644_vm0 = vcmp.gt.f32.partialorder %v2497_v46, 0.0 }
 0x194   :  { %v905_v48 = vor.u32 %v903_v45, %v902_v44  ;;  %v720_v51 = vsel %vm640_vm11, %v2455_v43, %v1840_v41  ;;  %v659_v36 = vmin.f32 %v2501_v49, 0.0  ;;  %vm643_vm3 = vcmp.gt.f32.partialorder %v2501_v49, 0.0 }
 0x195   :  { %v1002_v50 = vsel %vm2412_vm14, %v912_v21, %v1001_v37  ;;  %v838_v15 = vpack.c.bf16 %v720_v51, %v720_v51  ;;  %v719_v55 = vsel %vm639_vm12, %v2459_v34, %v1839_v5  ;;  %v691_v61 = vmul.f32 1.442695, %v660_v53  ;;  %v1029_v43 = vld [vmem:[#allocation2 + $0x38] sm:$0xff]  ;;  %v1016_v53 = vld [vmem:[#allocation2 + $0x70] sm:$0x1f] }
 0x196   :  { %1003 = vst [vmem:[#allocation2 + $0x48] sm:$0x1f] %v1002_v50  ;;  %v999_v54 = vsel %vm2412_vm14, %v905_v48, %v998_v47  ;;  %v837_v57 = vpack.c.bf16 %v719_v55, %v719_v55  ;;  %v1028_v58 = vld [vmem:[#allocation2 + $0x30] sm:$0xff]  ;;  %v689_v0 = vmul.f32 1.442695, %v659_v36 }
 0x197   :  { %1000 = vst [vmem:[#allocation2 + $0x40] sm:$0x1f] %v999_v54  ;;  %v921_v60 = vshrl.u32 %v838_v15, 16  ;;  %1965 = vmatprep.mubr.msk.bf16.mxu1 %vm1054_vm2, %v1028_v58  ;;  %2036 = vpow2.f32 %v691_v61  ;;  %v924_v22 = vshll.u32 %v838_v15, 16  ;;  %v1007_v34 = vld [vmem:[#allocation2 + $0x58] sm:$0x1f] }
 0x198   :  { %v914_v63 = vshrl.u32 %v837_v57, 16  ;;  %1966 = vmatmul.mubr.msk.bf16.gmra.mrb[12].mxu1 %vm1054_vm2, %v1029_v43  ;;  %v917_v4 = vshll.u32 %v837_v57, 16  ;;  %2038 = vpow2.f32 %v689_v0  ;;  %v1019_v48 = vld [vmem:[#allocation2 + $0x78] sm:$0x1f] }
 0x199   :  { %v2033_v62 = vpop.eup %2032  ;;  %v923_v19 = vrot.slane %v921_v60, 7 }
 0x19a   :  { %v1842_v12 = vadd.f32 -1.0, %v2033_v62  ;;  %v916_v3 = vrot.slane %v914_v63, 7  ;;  %v2035_v7 = vpop.eup %2034 }
 0x19b   :  { %v926_v39 = vor.u32 %v924_v22, %v923_v19  ;;  %v1841_v13 = vadd.f32 -1.0, %v2035_v7 }
 0x19c   :  { %v722_v10 = vsel %vm642_vm13, %v2476_v25, %v1842_v12  ;;  %v919_v38 = vor.u32 %v917_v4, %v916_v3  ;;  %vm1773_vm13 = vcmask 1044484  }
 0x19d   :  { %v840_v11 = vpack.c.bf16 %v722_v10, %v722_v10  ;;  %v1008_v16 = vsel %vm2412_vm14, %v926_v39, %v1007_v34  ;;  %v721_v20 = vsel %vm641_vm15, %v2484_v14, %v1841_v13  ;;  %v1031_v23 = vld [vmem:[#allocation2 + $0x48] sm:$0xff]  ;;  %vm1775_vm15 = vcmask 1045509  }
 0x19e   :  { %v1030_v17 = vld [vmem:[#allocation2 + $0x40] sm:$0xff]  ;;  %1009 = vst [vmem:[#allocation2 + $0x58] sm:$0x1f] %v1008_v16  ;;  %v1005_v18 = vsel %vm2412_vm14, %v919_v38, %v1004_v8  ;;  %v839_v25 = vpack.c.bf16 %v721_v20, %v721_v20 }
 0x19f   :  { %v935_v42 = vshrl.u32 %v840_v11, 16  ;;  %1969 = vmatprep.mubr.msk.bf16.mxu1 %vm1054_vm2, %v1030_v17  ;;  %1006 = vst [vmem:[#allocation2 + $0x50] sm:$0x1f] %v1005_v18  ;;  %v938_v27 = vshll.u32 %v840_v11, 16 }
 0x1a0   :  { %1970 = vmatmul.mubr.msk.bf16.gmra.mrb[16].mxu1 %vm1054_vm2, %v1031_v23  ;;  %v928_v59 = vshrl.u32 %v839_v25, 16  ;;  %v931_v29 = vshll.u32 %v839_v25, 16 }
 0x1a1   :  { %v937_v26 = vrot.slane %v935_v42, 7  ;;  %v2037_v28 = vpop.eup %2036 }
 0x1a2   :  { %v930_v52 = vrot.slane %v928_v59, 7  ;;  %v1844_v30 = vadd.f32 -1.0, %v2037_v28  ;;  %v2039_v31 = vpop.eup %2038 }
 0x1a3   :  { %v940_v6 = vor.u32 %v938_v27, %v937_v26  ;;  %v1843_v35 = vadd.f32 -1.0, %v2039_v31 }
 0x1a4   :  { %v933_v32 = vor.u32 %v931_v29, %v930_v52  ;;  %v724_v33 = vsel %vm644_vm0, %v2497_v46, %v1844_v30 }
 0x1a5   :  { %v1014_v14 = vsel %vm2412_vm14, %v940_v6, %v1013_v40  ;;  %v842_v24 = vpack.c.bf16 %v724_v33, %v724_v33  ;;  %v723_v45 = vsel %vm643_vm3, %v2501_v49, %v1843_v35  ;;  %v1033_v1 = vld [vmem:[#allocation2 + $0x58] sm:$0xff] }
 0x1a6   :  { %1015 = vst [vmem:[#allocation2 + $0x68] sm:$0x1f] %v1014_v14  ;;  %v1032_v37 = vld [vmem:[#allocation2 + $0x50] sm:$0xff]  ;;  %v1011_v44 = vsel %vm2412_vm14, %v933_v32, %v1010_v9  ;;  %v841_v21 = vpack.c.bf16 %v723_v45, %v723_v45 }
 0x1a7   :  { %1973 = vmatprep.mubr.msk.bf16.mxu1 %vm1054_vm2, %v1032_v37  ;;  %1012 = vst [vmem:[#allocation2 + $0x60] sm:$0x1f] %v1011_v44  ;;  %v949_v56 = vshrl.u32 %v842_v24, 16  ;;  %v952_v41 = vshll.u32 %v842_v24, 16 }
 0x1a8   :  { %1974 = vmatmul.mubr.msk.bf16.gmra.mrb[20].mxu1 %vm1054_vm2, %v1033_v1  ;;  %v942_v46 = vshrl.u32 %v841_v21, 16  ;;  %v945_v51 = vshll.u32 %v841_v21, 16 }
 0x1a9   :  { %v951_v47 = vrot.slane %v949_v56, 7 }
 0x1aa   :  { %v944_v50 = vrot.slane %v942_v46, 7 }
 0x1ab   :  { %v954_v5 = vor.u32 %v952_v41, %v951_v47 }
 0x1ac   :  { %v947_v49 = vor.u32 %v945_v51, %v944_v50 }
 0x1ad   :  { %v1020_v54 = vsel %vm2412_vm14, %v954_v5, %v1019_v48  ;;  %v1035_v57 = vld [vmem:[#allocation2 + $0x68] sm:$0xff] }
 0x1ae   :  { %1021 = vst [vmem:[#allocation2 + $0x78] sm:$0x1f] %v1020_v54  ;;  %v1034_v15 = vld [vmem:[#allocation2 + $0x60] sm:$0xff]  ;;  %v1017_v55 = vsel %vm2412_vm14, %v947_v49, %v1016_v53 }
 0x1af   :  { %1977 = vmatprep.mubr.msk.bf16.mxu1 %vm1054_vm2, %v1034_v15  ;;  %1018 = vst [vmem:[#allocation2 + $0x70] sm:$0x1f] %v1017_v55 }
 0x1b0   :  { %1978 = vmatmul.mubr.msk.bf16.gmra.mrb[24].mxu1 %vm1054_vm2, %v1035_v57 }
 0x1b5   :  { %v1037_v36 = vld [vmem:[#allocation2 + $0x78] sm:$0xff] }
 0x1b6   :  { %v1036_v61 = vld [vmem:[#allocation2 + $0x70] sm:$0xff] }
 0x1b7   :  { %1981 = vmatprep.mubr.msk.bf16.mxu1 %vm1054_vm2, %v1036_v61 }
 0x1b8   :  { %1982 = vmatmul.mubr.msk.bf16.gmra.mrb[28].mxu1 %vm1054_vm2, %v1037_v36  ;;  %vm1767_vm2 = vcmask 1041409  }
 0x253   :  { %v2542_v58 = vpop.f32.mrb[0].mxu1 }
 0x254   :  { %v2544_v60 = vpop.f32.mrb[1].mxu1  ;;  %v1299_v2 = vrot.slane %v2542_v58, 1  ;;  %v1411_v62 = vrot.slane %v2542_v58, 2 }
 0x255   :  { %v1956_v43 = vpop.f32.mrb[2].mxu1  ;;  %v1296_v22 = vrot.slane %v2544_v60, 1  ;;  %v1408_v12 = vrot.slane %v2544_v60, 2 }
 0x256   :  { %v1300_v63 = vrot.slane %v1956_v43, 1  ;;  %v1412_v0 = vrot.slane %v1956_v43, 2  ;;  %v1140_v19 = vpop.f32.mrb[3].mxu1 }
 0x257   :  { %v1297_v34 = vrot.slane %v1140_v19, 1  ;;  %v1409_v3 = vrot.slane %v1140_v19, 2 }
 0x258   :  { %v1301_v4 = vsel %vm380_vm9, %v1299_v2, %v1300_v63  ;;  %v1413_v7 = vsel %vm493_vm8, %v1411_v62, %v1412_v0 }
 0x259   :  { %1346 = vrot.lane.b32.xlu1 %v1301_v4, %s2074_s2  ;;  %v1298_v39 = vsel %vm380_vm9, %v1296_v22, %v1297_v34  ;;  %v1410_v8 = vsel %vm493_vm8, %v1408_v12, %v1409_v3 }
 0x25a   :  { %1344 = vrot.lane.b32.xlu0 %v1298_v39, %s2074_s2 }
 0x25b   :  { %v2556_v10 = vpop.f32.mrb[4].mxu1 }
 0x25c   :  { %v2558_v38 = vpop.f32.mrb[5].mxu1  ;;  %v1305_v13 = vrot.slane %v2556_v10, 1  ;;  %v1417_v16 = vrot.slane %v2556_v10, 2 }
 0x25d   :  { %v1960_v11 = vpop.f32.mrb[6].mxu1  ;;  %1458 = vrot.lane.b32.xlu1 %v1413_v7, %s2075_s6  ;;  %v1302_v20 = vrot.slane %v2558_v38, 1  ;;  %v1414_v25 = vrot.slane %v2558_v38, 2 }
 0x25e   :  { %v1306_v17 = vrot.slane %v1960_v11, 1  ;;  %v1418_v18 = vrot.slane %v1960_v11, 2  ;;  %v1156_v42 = vpop.f32.mrb[7].mxu1  ;;  %1456 = vrot.lane.b32.xlu0 %v1410_v8, %s2075_s6 }
 0x25f   :  { %v1303_v23 = vrot.slane %v1156_v42, 1  ;;  %v1415_v26 = vrot.slane %v1156_v42, 2 }
 0x260   :  { %v1307_v27 = vsel %vm380_vm9, %v1305_v13, %v1306_v17  ;;  %v1419_v40 = vsel %vm493_vm8, %v1417_v16, %v1418_v18 }
 0x261   :  { %v1304_v59 = vsel %vm380_vm9, %v1302_v20, %v1303_v23  ;;  %v1416_v28 = vsel %vm493_vm8, %v1414_v25, %v1415_v26 }
 0x262   :  { %1350 = vrot.lane.b32.xlu0 %v1307_v27, %s2074_s2 }
 0x263   :  { %v2571_v6 = vpop.f32.mrb[8].mxu1 }
 0x264   :  { %v2573_v52 = vpop.f32.mrb[9].mxu1  ;;  %v1311_v30 = vrot.slane %v2571_v6, 1  ;;  %v1423_v31 = vrot.slane %v2571_v6, 2 }
 0x265   :  { %v1964_v29 = vpop.f32.mrb[10].mxu1  ;;  %v1308_v33 = vrot.slane %v2573_v52, 1  ;;  %v1420_v35 = vrot.slane %v2573_v52, 2 }
 0x266   :  { %v1312_v14 = vrot.slane %v1964_v29, 1  ;;  %v1424_v9 = vrot.slane %v1964_v29, 2  ;;  %v1172_v32 = vpop.f32.mrb[11].mxu1  ;;  %1462 = vrot.lane.b32.xlu0 %v1419_v40, %s2075_s6 }
 0x267   :  { %v1309_v24 = vrot.slane %v1172_v32, 1  ;;  %v1421_v37 = vrot.slane %v1172_v32, 2 }
 0x268   :  { %v1313_v44 = vsel %vm380_vm9, %v1311_v30, %v1312_v14  ;;  %v1425_v45 = vsel %vm493_vm8, %v1423_v31, %v1424_v9 }
 0x269   :  { %v1310_v1 = vsel %vm380_vm9, %v1308_v33, %v1309_v24  ;;  %v1422_v56 = vsel %vm493_vm8, %v1420_v35, %v1421_v37 }
 0x26a   :  { %1348 = vrot.lane.b32.xlu0 %v1304_v59, %s2074_s2 }
 0x26b   :  { %v2585_v21 = vpop.f32.mrb[12].mxu1 }
 0x26c   :  { %v2587_v47 = vpop.f32.mrb[13].mxu1  ;;  %v1317_v46 = vrot.slane %v2585_v21, 1  ;;  %v1429_v48 = vrot.slane %v2585_v21, 2 }
 0x26d   :  { %v1968_v41 = vpop.f32.mrb[14].mxu1  ;;  %v1314_v53 = vrot.slane %v2587_v47, 1  ;;  %v1426_v54 = vrot.slane %v2587_v47, 2 }
 0x26e   :  { %1460 = vrot.lane.b32.xlu0 %v1416_v28, %s2075_s6  ;;  %v1318_v5 = vrot.slane %v1968_v41, 1  ;;  %v1430_v50 = vrot.slane %v1968_v41, 2  ;;  %v1188_v51 = vpop.f32.mrb[15].mxu1 }
 0x26f   :  { %v1315_v49 = vrot.slane %v1188_v51, 1  ;;  %v1427_v15 = vrot.slane %v1188_v51, 2 }
 0x270   :  { %v1319_v55 = vsel %vm380_vm9, %v1317_v46, %v1318_v5  ;;  %v2596_v57 = vsel %vm493_vm8, %v1429_v48, %v1430_v50 }
 0x271   :  { %v1316_v61 = vsel %vm380_vm9, %v1314_v53, %v1315_v49  ;;  %v2601_v36 = vsel %vm493_vm8, %v1426_v54, %v1427_v15 }
 0x272   :  { %1354 = vrot.lane.b32.xlu0 %v1313_v44, %s2074_s2 }
 0x273   :  { %v2603_v43 = vpop.f32.mrb[16].mxu1 }
 0x274   :  { %v2605_v2 = vpop.f32.mrb[17].mxu1  ;;  %v1323_v63 = vrot.slane %v2603_v43, 1  ;;  %v1435_v0 = vrot.slane %v2603_v43, 2 }
 0x275   :  { %v1972_v62 = vpop.f32.mrb[18].mxu1  ;;  %v1320_v34 = vrot.slane %v2605_v2, 1  ;;  %v1432_v3 = vrot.slane %v2605_v2, 2 }
 0x276   :  { %1466 = vrot.lane.b32.xlu0 %v1425_v45, %s2075_s6  ;;  %v1324_v19 = vrot.slane %v1972_v62, 1  ;;  %v1436_v22 = vrot.slane %v1972_v62, 2  ;;  %v1204_v12 = vpop.f32.mrb[19].mxu1 }
 0x277   :  { %v1321_v4 = vrot.slane %v1204_v12, 1  ;;  %v1433_v7 = vrot.slane %v1204_v12, 2 }
 0x278   :  { %v1325_v39 = vsel %vm380_vm9, %v1323_v63, %v1324_v19  ;;  %v1437_v8 = vsel %vm493_vm8, %v1435_v0, %v1436_v22 }
 0x279   :  { %1362 = vrot.lane.b32.xlu1 %v1325_v39, %s2074_s2  ;;  %v1322_v11 = vsel %vm380_vm9, %v1320_v34, %v1321_v4  ;;  %v1434_v13 = vsel %vm493_vm8, %v1432_v3, %v1433_v7 }
 0x27a   :  { %1352 = vrot.lane.b32.xlu0 %v1310_v1, %s2074_s2 }
 0x27b   :  { %v2618_v16 = vpop.f32.mrb[20].mxu1 }
 0x27c   :  { %v2620_v17 = vpop.f32.mrb[21].mxu1  ;;  %v1329_v42 = vrot.slane %v2618_v16, 1  ;;  %v1441_v20 = vrot.slane %v2618_v16, 2 }
 0x27d   :  { %v1976_v18 = vpop.f32.mrb[22].mxu1  ;;  %1474 = vrot.lane.b32.xlu1 %v1437_v8, %s2075_s6  ;;  %v1326_v27 = vrot.slane %v2620_v17, 1  ;;  %v1438_v40 = vrot.slane %v2620_v17, 2 }
 0x27e   :  { %1464 = vrot.lane.b32.xlu0 %v1422_v56, %s2075_s6  ;;  %v1330_v25 = vrot.slane %v1976_v18, 1  ;;  %v1442_v23 = vrot.slane %v1976_v18, 2  ;;  %v1220_v26 = vpop.f32.mrb[23].mxu1 }
 0x27f   :  { %v1327_v59 = vrot.slane %v1220_v26, 1  ;;  %v1439_v28 = vrot.slane %v1220_v26, 2 }
 0x280   :  { %v1331_v29 = vsel %vm380_vm9, %v1329_v42, %v1330_v25  ;;  %v1443_v30 = vsel %vm493_vm8, %v1441_v20, %v1442_v23 }
 0x281   :  { %1366 = vrot.lane.b32.xlu1 %v1331_v29, %s2074_s2  ;;  %v1328_v31 = vsel %vm380_vm9, %v1326_v27, %v1327_v59  ;;  %v1440_v14 = vsel %vm493_vm8, %v1438_v40, %v1439_v28 }
 0x282   :  { %1358 = vrot.lane.b32.xlu0 %v1319_v55, %s2074_s2 }
 0x283   :  { %v2634_v9 = vpop.f32.mrb[24].mxu1 }
 0x284   :  { %v2636_v32 = vpop.f32.mrb[25].mxu1  ;;  %v1335_v35 = vrot.slane %v2634_v9, 1  ;;  %v1447_v24 = vrot.slane %v2634_v9, 2 }
 0x285   :  { %1478 = vrot.lane.b32.xlu1 %v1443_v30, %s2075_s6  ;;  %v1980_v33 = vpop.f32.mrb[26].mxu1  ;;  %v1332_v1 = vrot.slane %v2636_v32, 1  ;;  %v1444_v56 = vrot.slane %v2636_v32, 2 }
 0x286   :  { %1356 = vrot.lane.b32.xlu0 %v1316_v61, %s2074_s2  ;;  %v1336_v37 = vrot.slane %v1980_v33, 1  ;;  %v1448_v44 = vrot.slane %v1980_v33, 2  ;;  %v1236_v45 = vpop.f32.mrb[27].mxu1 }
 0x287   :  { %v1333_v41 = vrot.slane %v1236_v45, 1  ;;  %v1445_v46 = vrot.slane %v1236_v45, 2 }
 0x288   :  { %v1337_v48 = vsel %vm380_vm9, %v1335_v35, %v1336_v37  ;;  %v1449_v5 = vsel %vm493_vm8, %v1447_v24, %v1448_v44 }
 0x289   :  { %1364 = vrot.lane.b32.xlu1 %v1328_v31, %s2074_s2  ;;  %v1334_v50 = vsel %vm380_vm9, %v1332_v1, %v1333_v41  ;;  %v1446_v51 = vsel %vm493_vm8, %v1444_v56, %v1445_v46 }
 0x28a   :  { %1360 = vrot.lane.b32.xlu0 %v1322_v11, %s2074_s2 }
 0x28b   :  { %v2650_v53 = vpop.f32.mrb[28].mxu1 }
 0x28c   :  { %v2654_v54 = vpop.f32.mrb[29].mxu1  ;;  %v1341_v15 = vrot.slane %v2650_v53, 1  ;;  %v1453_v55 = vrot.slane %v2650_v53, 2 }
 0x28d   :  { %1476 = vrot.lane.b32.xlu1 %v1440_v14, %s2075_s6  ;;  %v1984_v49 = vpop.f32.mrb[30].mxu1  ;;  %v1338_v0 = vrot.slane %v2654_v54, 1  ;;  %v1450_v19 = vrot.slane %v2654_v54, 2 }
 0x28e   :  { %1472 = vrot.lane.b32.xlu0 %v1434_v13, %s2075_s6  ;;  %v1342_v61 = vrot.slane %v1984_v49, 1  ;;  %v1454_v62 = vrot.slane %v1984_v49, 2  ;;  %v1252_v63 = vpop.f32.mrb[31].mxu1 }
 0x28f   :  { %v1339_v22 = vrot.slane %v1252_v63, 1  ;;  %v1451_v12 = vrot.slane %v1252_v63, 2 }
 0x290   :  { %v1343_v34 = vsel %vm380_vm9, %v1341_v15, %v1342_v61  ;;  %v1455_v3 = vsel %vm493_vm8, %v1453_v55, %v1454_v62 }
 0x291   :  { %1370 = vrot.lane.b32.xlu1 %v1337_v48, %s2074_s2  ;;  %v1340_v4 = vsel %vm380_vm9, %v1338_v0, %v1339_v22  ;;  %v1452_v7 = vsel %vm493_vm8, %v1450_v19, %v1451_v12 }
 0x292   :  { %1468 = vrot.lane.b32.xlu0 %v2601_v36, %s2075_s6 }
 0x295   :  { %1482 = vrot.lane.b32.xlu1 %v1449_v5, %s2075_s6 }
 0x296   :  { %1470 = vrot.lane.b32.xlu0 %v2596_v57, %s2075_s6  ;;  %v2681_v57 = vld [vmem:[%s2812_s4] ss:$0 sm:$0xff] }
 0x299   :  { %1368 = vrot.lane.b32.xlu1 %v1334_v50, %s2074_s2 }
 0x29d   :  { %1480 = vrot.lane.b32.xlu1 %v1446_v51, %s2075_s6 }
 0x2a1   :  { %1374 = vrot.lane.b32.xlu1 %v1343_v34, %s2074_s2 }
 0x2a5   :  { %1372 = vrot.lane.b32.xlu1 %v1340_v4, %s2074_s2 }
 0x2a9   :  { %1484 = vrot.lane.b32.xlu1 %v1452_v7, %s2075_s6 }
 0x2ad   :  { %1486 = vrot.lane.b32.xlu1 %v1455_v3, %s2075_s6 }
 0x2cb   :  { %v1347_v36 = vpop.permute.xlu1 %1346 }
 0x2cc   :  { %v1345_v39 = vpop.permute.xlu0 %1344  ;;  %v1393_v8 = vadd.f32 %v2542_v58, %v1347_v36 }
 0x2cd   :  { %v1392_v11 = vadd.f32 %v1345_v39, %v2544_v60 }
 0x2cf   :  { %v1459_v13 = vpop.permute.xlu1 %1458 }
 0x2d0   :  { %v1505_v18 = vadd.f32 %v1459_v13, %v1393_v8  ;;  %v1457_v42 = vpop.permute.xlu0 %1456 }
 0x2d1   :  { %v1504_v20 = vadd.f32 %v1457_v42, %v1392_v11 }
 0x2d2   :  { %v1528_v25 = vadd.f32 %v2681_v57, %v1505_v18 }
 0x2d3   :  { %v1527_v23 = vadd.f32 %v2681_v57, %v1504_v20 }
 0x2d4   :  { %v1560_v26 = vmin.f32 %v1528_v25, 0.0  ;;  %v1351_v27 = vpop.permute.xlu0 %1350  ;;  %vm1544_vm8 = vcmp.gt.f32.partialorder %v1528_v25, 0.0 }
 0x2d5   :  { %v1559_v40 = vmin.f32 %v1527_v23, 0.0  ;;  %v1395_v60 = vadd.f32 %v2556_v10, %v1351_v27  ;;  %vm1543_vm9 = vcmp.gt.f32.partialorder %v1527_v23, 0.0 }
 0x2d6   :  { %v1577_v59 = vmul.f32 1.442695, %v1560_v26 }
 0x2d7   :  { %v1575_v58 = vmul.f32 1.442695, %v1559_v40 }
 0x2d8   :  { %2040 = vpow2.f32 %v1577_v59  ;;  %v1463_v28 = vpop.permute.xlu0 %1462 }
 0x2d9   :  { %2042 = vpow2.f32 %v1575_v58  ;;  %v1507_v29 = vadd.f32 %v1463_v28, %v1395_v60 }
 0x2db   :  { %v1530_v30 = vadd.f32 %v2681_v57, %v1507_v29 }
 0x2dc   :  { %v1349_v31 = vpop.permute.xlu0 %1348 }
 0x2dd   :  { %v1562_v14 = vmin.f32 %v1530_v30, 0.0  ;;  %v1394_v35 = vadd.f32 %v1349_v31, %v2558_v38  ;;  %vm1546_vm14 = vcmp.gt.f32.partialorder %v1530_v30, 0.0 }
 0x2df   :  { %v1581_v33 = vmul.f32 1.442695, %v1562_v14 }
 0x2e0   :  { %v1461_v24 = vpop.permute.xlu0 %1460 }
 0x2e1   :  { %2044 = vpow2.f32 %v1581_v33  ;;  %v1506_v37 = vadd.f32 %v1461_v24, %v1394_v35 }
 0x2e2   :  { %v2041_v44 = vpop.eup %2040 }
 0x2e3   :  { %v2043_v45 = vpop.eup %2042  ;;  %v1865_v1 = vadd.f32 -1.0, %v2041_v44  ;;  %v1529_v56 = vadd.f32 %v2681_v57, %v1506_v37 }
 0x2e4   :  { %v1864_v10 = vadd.f32 -1.0, %v2043_v45  ;;  %v1355_v41 = vpop.permute.xlu0 %1354 }
 0x2e5   :  { %v1624_v46 = vsel %vm1544_vm8, %v1528_v25, %v1865_v1  ;;  %v1561_v48 = vmin.f32 %v1529_v56, 0.0  ;;  %v1397_v15 = vadd.f32 %v2571_v6, %v1355_v41  ;;  %vm1545_vm4 = vcmp.gt.f32.partialorder %v1529_v56, 0.0 }
 0x2e6   :  { %v1646_v5 = vsel %vm134_vm1, %v1624_v46, -inf  ;;  %v1623_v50 = vsel %vm1543_vm9, %v1527_v23, %v1864_v10 }
 0x2e7   :  { %v1647_v51 = vrot.slane %v1646_v5, 4  ;;  %v1639_v38 = vsel %vm134_vm1, %v1623_v50, -inf  ;;  %v1579_v49 = vmul.f32 1.442695, %v1561_v48 }
 0x2e8   :  { %v1640_v55 = vrot.slane %v1639_v38, 4  ;;  %v1467_v61 = vpop.permute.xlu0 %1466 }
 0x2e9   :  { %v1648_v62 = vmax.f32 %v1646_v5, %v1647_v51  ;;  %2046 = vpow2.f32 %v1579_v49  ;;  %v1509_v63 = vadd.f32 %v1467_v61, %v1397_v15 }
 0x2ea   :  { %v1641_v0 = vmax.f32 %v1639_v38, %v1640_v55 }
 0x2eb   :  { %v2045_v19 = vpop.eup %2044  ;;  %v1649_v22 = vrot.slane %v1648_v62, 2  ;;  %v1532_v12 = vadd.f32 %v2681_v57, %v1509_v63  ;;  %v1363_v4 = vpop.permute.xlu1 %1362 }
 0x2ec   :  { %v1642_v34 = vrot.slane %v1641_v0, 2  ;;  %v1867_v3 = vadd.f32 -1.0, %v2045_v19  ;;  %v1353_v7 = vpop.permute.xlu0 %1352  ;;  %v1401_v6 = vadd.f32 %v2603_v43, %v1363_v4 }
 0x2ed   :  { %v1650_v36 = vmax.f32 %v1648_v62, %v1649_v22  ;;  %v1564_v39 = vmin.f32 %v1532_v12, 0.0  ;;  %v1396_v20 = vadd.f32 %v1353_v7, %v2573_v52  ;;  %vm1548_vm5 = vcmp.gt.f32.partialorder %v1532_v12, 0.0 }
 0x2ee   :  { %v1643_v8 = vmax.f32 %v1641_v0, %v1642_v34  ;;  %v1626_v11 = vsel %vm1546_vm14, %v1530_v30, %v1867_v3 }
 0x2ef   :  { %v1651_v13 = vrot.slane %v1650_v36, 1  ;;  %v1660_v18 = vsel %vm134_vm1, %v1626_v11, -inf  ;;  %v1585_v42 = vmul.f32 1.442695, %v1564_v39  ;;  %v1475_v26 = vpop.permute.xlu1 %1474 }
 0x2f0   :  { %v1644_v25 = vrot.slane %v1643_v8, 1  ;;  %v1661_v23 = vrot.slane %v1660_v18, 4  ;;  %v1465_v27 = vpop.permute.xlu0 %1464  ;;  %v1513_v59 = vadd.f32 %v1475_v26, %v1401_v6 }
 0x2f1   :  { %v1652_v40 = vmax.f32 %v1650_v36, %v1651_v13  ;;  %2048 = vpow2.f32 %v1585_v42  ;;  %v1508_v58 = vadd.f32 %v1465_v27, %v1396_v20 }
 0x2f2   :  { %v1645_v60 = vmax.f32 %v1643_v8, %v1644_v25  ;;  %v1662_v28 = vmax.f32 %v1660_v18, %v1661_v23  ;;  %v2697_v43 = vadd.f32 %v2681_v57, %v1513_v59 }
 0x2f3   :  { %v2047_v29 = vpop.eup %2046  ;;  %v2700_v30 = vadd.f32 %v2681_v57, %v1508_v58  ;;  %v1367_v14 = vpop.permute.xlu1 %1366 }
 0x2f4   :  { %v1768_v52 = vsel %vm1767_vm2, %v1652_v40, %v1645_v60  ;;  %v1866_v31 = vadd.f32 -1.0, %v2047_v29  ;;  %v1359_v33 = vpop.permute.xlu0 %1358  ;;  %v1568_v35 = vmin.f32 %v2697_v43, 0.0  ;;  %v1663_v37 = vrot.slane %v1662_v28, 2 }
 0x2f5   :  { %v1563_v24 = vmin.f32 %v2700_v30, 0.0  ;;  %v1403_v41 = vadd.f32 %v2618_v16, %v1367_v14  ;;  %vm1552_vm10 = vcmp.gt.f32.partialorder %v2697_v43, 0.0  ;;  %vm1547_vm11 = vcmp.gt.f32.partialorder %v2700_v30, 0.0 }
 0x2f6   :  { %v1625_v44 = vsel %vm1545_vm4, %v1529_v56, %v1866_v31  ;;  %v1593_v1 = vmul.f32 1.442695, %v1568_v35  ;;  %v1664_v51 = vmax.f32 %v1662_v28, %v1663_v37  ;;  %v1399_v28 = vadd.f32 %v2585_v21, %v1359_v33 }
 0x2f7   :  { %v1653_v45 = vsel %vm134_vm1, %v1625_v44, -inf  ;;  %v1583_v10 = vmul.f32 1.442695, %v1563_v24  ;;  %v1479_v48 = vpop.permute.xlu1 %1478 }
 0x2f8   :  { %v1654_v46 = vrot.slane %v1653_v45, 4  ;;  %v1357_v5 = vpop.permute.xlu0 %1356  ;;  %2050 = vpow2.f32 %v1593_v1  ;;  %v1515_v50 = vadd.f32 %v1479_v48, %v1403_v41  ;;  %v1665_v16 = vrot.slane %v1664_v51, 1 }
 0x2f9   :  { %2052 = vpow2.f32 %v1583_v10  ;;  %v1398_v31 = vadd.f32 %v1357_v5, %v2587_v47 }
 0x2fa   :  { %v1655_v38 = vmax.f32 %v1653_v45, %v1654_v46  ;;  %v2708_v15 = vadd.f32 %v2681_v57, %v1515_v50  ;;  %v1666_v42 = vmax.f32 %v1664_v51, %v1665_v16 }
 0x2fb   :  { %v2049_v49 = vpop.eup %2048  ;;  %v1365_v61 = vpop.permute.xlu1 %1364 }
 0x2fc   :  { %v1656_v55 = vrot.slane %v1655_v38, 2  ;;  %v1869_v56 = vadd.f32 -1.0, %v2049_v49  ;;  %v1361_v62 = vpop.permute.xlu0 %1360  ;;  %v1570_v63 = vmin.f32 %v2708_v15, 0.0  ;;  %v1402_v3 = vadd.f32 %v1365_v61, %v2620_v17 }
 0x2fd   :  { %v1400_v4 = vadd.f32 %v1361_v62, %v2605_v2  ;;  %vm1554_vm12 = vcmp.gt.f32.partialorder %v2708_v15, 0.0 }
 0x2fe   :  { %v1657_v0 = vmax.f32 %v1655_v38, %v1656_v55  ;;  %v1628_v19 = vsel %vm1548_vm5, %v1532_v12, %v1869_v56  ;;  %v1597_v34 = vmul.f32 1.442695, %v1570_v63  ;;  %vm1777_vm5 = vcmask 1046534  }
 0x2ff   :  { %v1674_v22 = vsel %vm134_vm1, %v1628_v19, -inf  ;;  %v1477_v39 = vpop.permute.xlu1 %1476 }
 0x300   :  { %v1658_v7 = vrot.slane %v1657_v0, 1  ;;  %v1675_v36 = vrot.slane %v1674_v22, 4  ;;  %v1473_v8 = vpop.permute.xlu0 %1472  ;;  %2054 = vpow2.f32 %v1597_v34  ;;  %v1514_v11 = vadd.f32 %v1477_v39, %v1402_v3 }
 0x301   :  { %v1512_v6 = vadd.f32 %v1473_v8, %v1400_v4 }
 0x302   :  { %v1659_v13 = vmax.f32 %v1657_v0, %v1658_v7  ;;  %v2051_v18 = vpop.eup %2050  ;;  %v2715_v12 = vadd.f32 %v2681_v57, %v1514_v11  ;;  %v1676_v25 = vmax.f32 %v1674_v22, %v1675_v36 }
 0x303   :  { %v2718_v20 = vadd.f32 %v2681_v57, %v1512_v6  ;;  %v2053_v17 = vpop.eup %2052  ;;  %v1873_v23 = vadd.f32 -1.0, %v2051_v18  ;;  %v1371_v26 = vpop.permute.xlu1 %1370 }
 0x304   :  { %v1770_v2 = vsel %vm1769_vm6, %v1659_v13, %v1768_v52  ;;  %v1469_v27 = vpop.permute.xlu0 %1468  ;;  %v1868_v59 = vadd.f32 -1.0, %v2053_v17  ;;  %v1569_v58 = vmin.f32 %v2715_v12, 0.0  ;;  %v1405_v35 = vadd.f32 %v2634_v9, %v1371_v26 }
 0x305   :  { %v2723_v40 = vsel %vm1771_vm7, %v1666_v42, %v1770_v2  ;;  %v1632_v60 = vsel %vm1552_vm10, %v2697_v43, %v1873_v23  ;;  %v1567_v29 = vmin.f32 %v2718_v20, 0.0  ;;  %v1677_v24 = vrot.slane %v1676_v25, 2 }
 0x306   :  { %v1627_v52 = vsel %vm1547_vm11, %v2700_v30, %v1868_v59  ;;  %v1595_v14 = vmul.f32 1.442695, %v1569_v58  ;;  %v1702_v37 = vsel %vm134_vm1, %v1632_v60, -inf  ;;  %v1510_v21 = vadd.f32 %v1469_v27, %v1398_v31 }
 0x307   :  { %v1667_v44 = vsel %vm134_vm1, %v1627_v52, -inf  ;;  %v1591_v45 = vmul.f32 1.442695, %v1567_v29  ;;  %v1483_v43 = vpop.permute.xlu1 %1482  ;;  %v1678_v48 = vmax.f32 %v1676_v25, %v1677_v24  ;;  %v1703_v5 = vrot.slane %v1702_v37, 4 }
 0x308   :  { %v1471_v1 = vpop.permute.xlu0 %1470  ;;  %v1668_v10 = vrot.slane %v1667_v44, 4  ;;  %2056 = vpow2.f32 %v1595_v14  ;;  %v1517_v33 = vadd.f32 %v1483_v43, %v1405_v35  ;;  %v2736_v47 = vadd.f32 %v2681_v57, %v1510_v21 }
 0x309   :  { %2058 = vpow2.f32 %v1591_v45  ;;  %v1511_v41 = vadd.f32 %v1471_v1, %v1399_v28  ;;  %v1679_v19 = vrot.slane %v1678_v48, 1  ;;  %v1704_v22 = vmax.f32 %v1702_v37, %v1703_v5 }
 0x30a   :  { %v2055_v30 = vpop.eup %2054  ;;  %v1669_v46 = vmax.f32 %v1667_v44, %v1668_v10  ;;  %v2739_v9 = vadd.f32 %v2681_v57, %v1517_v33  ;;  %v1565_v55 = vmin.f32 %v2736_v47, 0.0  ;;  %vm1553_vm0 = vcmp.gt.f32.partialorder %v2715_v12, 0.0 }
 0x30b   :  { %v1875_v50 = vadd.f32 -1.0, %v2055_v30  ;;  %v2742_v51 = vadd.f32 %v2681_v57, %v1511_v41  ;;  %v1369_v38 = vpop.permute.xlu1 %1368  ;;  %v1680_v13 = vmax.f32 %v1678_v48, %v1679_v19  ;;  %v1705_v18 = vrot.slane %v1704_v22, 2 }
 0x30c   :  { %v1670_v49 = vrot.slane %v1669_v46, 2  ;;  %v1572_v61 = vmin.f32 %v2739_v9, 0.0  ;;  %v1587_v16 = vmul.f32 1.442695, %v1565_v55  ;;  %v1404_v3 = vadd.f32 %v1369_v38, %v2636_v32 }
 0x30d   :  { %v1634_v56 = vsel %vm1554_vm12, %v2708_v15, %v1875_v50  ;;  %v1566_v0 = vmin.f32 %v2742_v51, 0.0  ;;  %vm1551_vm3 = vcmp.gt.f32.partialorder %v2718_v20, 0.0  ;;  %v1706_v28 = vmax.f32 %v1704_v22, %v1705_v18 }
 0x30e   :  { %v1671_v62 = vmax.f32 %v1669_v46, %v1670_v49  ;;  %v1716_v63 = vsel %vm134_vm1, %v1634_v56, -inf  ;;  %v1601_v34 = vmul.f32 1.442695, %v1572_v61  ;;  %2060 = vpow2.f32 %v1587_v16 }
 0x30f   :  { %v1481_v4 = vpop.permute.xlu1 %1480  ;;  %v1717_v36 = vrot.slane %v1716_v63, 4  ;;  %v1589_v39 = vmul.f32 1.442695, %v1566_v0  ;;  %vm1549_vm8 = vcmp.gt.f32.partialorder %v2736_v47, 0.0  ;;  %vm1556_vm9 = vcmp.gt.f32.partialorder %v2739_v9, 0.0 }
 0x310   :  { %v1672_v7 = vrot.slane %v1671_v62, 1  ;;  %2062 = vpow2.f32 %v1601_v34  ;;  %v1516_v15 = vadd.f32 %v1481_v4, %v1404_v3  ;;  %v1707_v45 = vrot.slane %v1706_v28, 1 }
 0x311   :  { %2064 = vpow2.f32 %v1589_v39  ;;  %v1718_v25 = vmax.f32 %v1716_v63, %v1717_v36  ;;  %vm1550_vm14 = vcmp.gt.f32.partialorder %v2742_v51, 0.0 }
 0x312   :  { %v2057_v8 = vpop.eup %2056  ;;  %v1673_v11 = vmax.f32 %v1671_v62, %v1672_v7  ;;  %v2752_v17 = vadd.f32 %v2681_v57, %v1516_v15 }
 0x313   :  { %v2059_v6 = vpop.eup %2058  ;;  %v1874_v42 = vadd.f32 -1.0, %v2057_v8  ;;  %v1375_v32 = vpop.permute.xlu1 %1374  ;;  %v1719_v31 = vrot.slane %v1718_v25, 2 }
 0x314   :  { %v1774_v2 = vsel %vm1773_vm13, %v1673_v11, %v2723_v40  ;;  %v1872_v23 = vadd.f32 -1.0, %v2059_v6  ;;  %v1571_v60 = vmin.f32 %v2752_v17, 0.0  ;;  %vm1555_vm4 = vcmp.gt.f32.partialorder %v2752_v17, 0.0 }
 0x315   :  { %v1633_v26 = vsel %vm1553_vm0, %v2715_v12, %v1874_v42  ;;  %v2760_v27 = vsel %vm1775_vm15, %v1680_v13, %v1774_v2  ;;  %v1720_v33 = vmax.f32 %v1718_v25, %v1719_v31 }
 0x316   :  { %v1709_v59 = vsel %vm134_vm1, %v1633_v26, -inf  ;;  %v1631_v58 = vsel %vm1551_vm3, %v2718_v20, %v1872_v23  ;;  %v1599_v35 = vmul.f32 1.442695, %v1571_v60 }
 0x317   :  { %v1710_v29 = vrot.slane %v1709_v59, 4  ;;  %v1695_v40 = vsel %vm134_vm1, %v1631_v58, -inf  ;;  %v1373_v52 = vpop.permute.xlu1 %1372  ;;  %v1721_v0 = vrot.slane %v1720_v33, 1 }
 0x318   :  { %v1696_v14 = vrot.slane %v1695_v40, 4  ;;  %v2061_v24 = vpop.eup %2060  ;;  %2066 = vpow2.f32 %v1599_v35  ;;  %v1406_v20 = vadd.f32 %v1373_v52, %v2654_v54  ;;  %v1407_v54 = vadd.f32 %v2650_v53, %v1375_v32 }
 0x319   :  { %v1711_v12 = vmax.f32 %v1709_v59, %v1710_v29  ;;  %v1870_v1 = vadd.f32 -1.0, %v2061_v24  ;;  %v1722_v13 = vmax.f32 %v1720_v33, %v1721_v0 }
 0x31a   :  { %v1697_v37 = vmax.f32 %v1695_v40, %v1696_v14  ;;  %v2063_v44 = vpop.eup %2062 }
 0x31b   :  { %v1712_v43 = vrot.slane %v1711_v12, 2  ;;  %v1485_v10 = vpop.permute.xlu1 %1484  ;;  %v2065_v21 = vpop.eup %2064  ;;  %v1877_v30 = vadd.f32 -1.0, %v2063_v44  ;;  %v1629_v5 = vsel %vm1549_vm8, %v2736_v47, %v1870_v1 }
 0x31c   :  { %v1698_v41 = vrot.slane %v1697_v37, 2  ;;  %v1518_v46 = vadd.f32 %v1485_v10, %v1406_v20  ;;  %v1871_v50 = vadd.f32 -1.0, %v2065_v21  ;;  %v1681_v49 = vsel %vm134_vm1, %v1629_v5, -inf }
 0x31d   :  { %v1713_v48 = vmax.f32 %v1711_v12, %v1712_v43  ;;  %v1636_v55 = vsel %vm1556_vm9, %v2739_v9, %v1877_v30  ;;  %v1682_v62 = vrot.slane %v1681_v49, 4  ;;  %v1708_v9 = vmax.f32 %v1706_v28, %v1707_v45 }
 0x31e   :  { %v1699_v38 = vmax.f32 %v1697_v37, %v1698_v41  ;;  %v1541_v56 = vadd.f32 %v2681_v57, %v1518_v46  ;;  %v1730_v63 = vsel %vm134_vm1, %v1636_v55, -inf  ;;  %v1630_v47 = vsel %vm1550_vm14, %v2742_v51, %v1871_v50 }
 0x31f   :  { %v1714_v61 = vrot.slane %v1713_v48, 1  ;;  %v1487_v16 = vpop.permute.xlu1 %1486  ;;  %v1731_v19 = vrot.slane %v1730_v63, 4  ;;  %v1688_v22 = vsel %vm134_vm1, %v1630_v47, -inf  ;;  %v1683_v34 = vmax.f32 %v1681_v49, %v1682_v62 }
 0x320   :  { %v1700_v53 = vrot.slane %v1699_v38, 1  ;;  %v1689_v3 = vrot.slane %v1688_v22, 4  ;;  %v1573_v4 = vmin.f32 %v1541_v56, 0.0  ;;  %v1519_v36 = vadd.f32 %v1487_v16, %v1407_v54 }
 0x321   :  { %v1715_v39 = vmax.f32 %v1713_v48, %v1714_v61  ;;  %v1684_v15 = vrot.slane %v1683_v34, 2  ;;  %v1732_v18 = vmax.f32 %v1730_v63, %v1731_v19 }
 0x322   :  { %v1701_v7 = vmax.f32 %v1699_v38, %v1700_v53  ;;  %v1690_v8 = vmax.f32 %v1688_v22, %v1689_v3  ;;  %v1603_v11 = vmul.f32 1.442695, %v1573_v4  ;;  %v2067_v6 = vpop.eup %2066  ;;  %v1542_v42 = vadd.f32 %v2681_v57, %v1519_v36 }
 0x323   :  { %v1685_v2 = vmax.f32 %v1683_v34, %v1684_v15  ;;  %v1876_v23 = vadd.f32 -1.0, %v2067_v6  ;;  %v1733_v29 = vrot.slane %v1732_v18, 2 }
 0x324   :  { %v1781_v51 = vsel %vm1767_vm2, %v1708_v9, %v1701_v7  ;;  %v1691_v25 = vrot.slane %v1690_v8, 2  ;;  %2068 = vpow2.f32 %v1603_v11  ;;  %v1574_v28 = vmin.f32 %v1542_v42, 0.0 }
 0x325   :  { %v1782_v32 = vsel %vm1769_vm6, %v1715_v39, %v1781_v51  ;;  %v1686_v59 = vrot.slane %v1685_v2, 1  ;;  %v1635_v60 = vsel %vm1555_vm4, %v2752_v17, %v1876_v23  ;;  %vm1779_vm2 = vcmask 1047559  }
 0x326   :  { %v1783_v26 = vsel %vm1771_vm7, %v1722_v13, %v1782_v32  ;;  %v1692_v58 = vmax.f32 %v1690_v8, %v1691_v25  ;;  %v1723_v40 = vsel %vm134_vm1, %v1635_v60, -inf  ;;  %v1605_v14 = vmul.f32 1.442695, %v1574_v28 }
 0x327   :  { %v1687_v57 = vmax.f32 %v1685_v2, %v1686_v59  ;;  %v1724_v31 = vrot.slane %v1723_v40, 4  ;;  %v1734_v37 = vmax.f32 %v1732_v18, %v1733_v29  ;;  %vm1557_vm6 = vcmp.gt.f32.partialorder %v1541_v56, 0.0 }
 0x328   :  { %v1693_v52 = vrot.slane %v1692_v58, 1  ;;  %2070 = vpow2.f32 %v1605_v14  ;;  %vm1558_vm7 = vcmp.gt.f32.partialorder %v1542_v42, 0.0 }
 0x329   :  { %v1778_v35 = vsel %vm1777_vm5, %v1687_v57, %v2760_v27  ;;  %v1725_v24 = vmax.f32 %v1723_v40, %v1724_v31  ;;  %v1735_v43 = vrot.slane %v1734_v37, 1 }
 0x32a   :  { %v1694_v12 = vmax.f32 %v1692_v58, %v1693_v52 }
 0x32b   :  { %v1726_v17 = vrot.slane %v1725_v24, 2  ;;  %v1736_v33 = vmax.f32 %v1734_v37, %v1735_v43 }
 0x32c   :  { %v1780_v20 = vsel %vm1779_vm2, %v1694_v12, %v1778_v35 }
 0x32d   :  { %1790 = vst.msk [vmem:[%s2813_s5] sm:$0xff] %vm134_vm1, %v1780_v20  ;;  %v1727_v44 = vmax.f32 %v1725_v24, %v1726_v17 }
 0x32e   :  { %v2069_v45 = vpop.eup %2068 }
 0x32f   :  { %v1728_v1 = vrot.slane %v1727_v44, 1  ;;  %v1878_v10 = vadd.f32 -1.0, %v2069_v45 }
 0x331   :  { %v1729_v21 = vmax.f32 %v1727_v44, %v1728_v1  ;;  %v1637_v27 = vsel %vm1557_vm6, %v1541_v56, %v1878_v10 }
 0x332   :  { %v1737_v41 = vsel %vm134_vm1, %v1637_v27, -inf  ;;  %v2071_v30 = vpop.eup %2070 }
 0x333   :  { %v1784_v46 = vsel %vm1773_vm13, %v1729_v21, %v1783_v26  ;;  %v1738_v48 = vrot.slane %v1737_v41, 4  ;;  %v1879_v50 = vadd.f32 -1.0, %v2071_v30 }
 0x334   :  { %v1785_v5 = vsel %vm1775_vm15, %v1736_v33, %v1784_v46 }
 0x335   :  { %v1739_v54 = vmax.f32 %v1737_v41, %v1738_v48  ;;  %v1638_v38 = vsel %vm1558_vm7, %v1542_v42, %v1879_v50 }
 0x336   :  { %v1744_v55 = vsel %vm134_vm1, %v1638_v38, -inf }
 0x337   :  { %v1740_v49 = vrot.slane %v1739_v54, 2  ;;  %v1745_v61 = vrot.slane %v1744_v55, 4 }
 0x339   :  { %v1741_v62 = vmax.f32 %v1739_v54, %v1740_v49  ;;  %v1746_v63 = vmax.f32 %v1744_v55, %v1745_v61 }
 0x33b   :  { %v1742_v56 = vrot.slane %v1741_v62, 1  ;;  %v1747_v47 = vrot.slane %v1746_v63, 2 }
 0x33d   :  { %v1743_v16 = vmax.f32 %v1741_v62, %v1742_v56  ;;  %v1748_v0 = vmax.f32 %v1746_v63, %v1747_v47 }
 0x33f   :  { %v1786_v53 = vsel %vm1777_vm5, %v1743_v16, %v1785_v5  ;;  %v1749_v19 = vrot.slane %v1748_v0, 1 }
 0x341   :  { %v1750_v22 = vmax.f32 %v1748_v0, %v1749_v19 }
 0x343   :  { %v1787_v34 = vsel %vm1779_vm2, %v1750_v22, %v1786_v53 }
 0x344   :  { %1791 = vst.msk [vmem:[%s2813_s5 + $0x8] sm:$0xff] %vm134_vm1, %v1787_v34 }

</bundles_post_ra>
